<compile_context>
chip_gen: v6e
topology: v6e:2x2x1
jax: 0.10.0
libtpu: 0.0.40
codegen_flags: <defaults>
</compile_context>

<pallas_src>
import math
import functools

import jax
import jax.numpy as jnp
from jax import lax
from jax.experimental import pallas as pl
from jax.experimental.pallas import tpu as pltpu


def bert_layer_kernel(hq_ref, hkv_ref, mask_ref,
                      wq_ref, wk_ref, wv_ref, wo_ref,
                      ln1_g_ref, ln1_b_ref,
                      w_up_ref, b_up_ref, w_down_ref, b_down_ref,
                      ln2_g_ref, ln2_b_ref,
                      out_ref,
                      *, num_heads, inv_denom, eps):
    f32 = jnp.float32
    cdt = wq_ref.dtype                       # MXU compute dtype (bf16)

    hq = hq_ref[0]                           # (TQ, H) f32  -- query tile (residual path)
    hkv = hkv_ref[0]                         # (S,  H) f32  -- full sequence (K/V path)
    mask = mask_ref[0]                       # (NH, TQ, S) f32 additive bias slice
    TQ, H = hq.shape
    S = hkv.shape[0]
    HD = H // num_heads

    # --- QKV projections (bf16 MXU matmuls, f32 accumulation) ----------------
    # 1/sqrt(hidden_size) folded into q once (spec scales by sqrt(H), not sqrt(HD)).
    q = jnp.dot(hq.astype(cdt), wq_ref[...], preferred_element_type=f32) * inv_denom
    k = jnp.dot(hkv.astype(cdt), wk_ref[...], preferred_element_type=f32)
    v = jnp.dot(hkv.astype(cdt), wv_ref[...], preferred_element_type=f32)

    # --- Attention: fold each head's context straight into the output proj ---
    #     attn_out = sum_h softmax(q_h k_h^T + m_h) v_h @ wo[h]
    attn_out = jnp.zeros((TQ, H), f32)
    for hi in range(num_heads):
        lo = hi * HD
        qh = lax.slice(q, (0, lo), (TQ, lo + HD)).astype(cdt)    # (TQ, HD)
        kh = lax.slice(k, (0, lo), (S, lo + HD)).astype(cdt)     # (S,  HD)
        vh = lax.slice(v, (0, lo), (S, lo + HD)).astype(cdt)     # (S,  HD)

        # q_h @ k_h^T without materializing the transpose.
        s = lax.dot_general(qh, kh, (((1,), (1,)), ((), ())),
                            preferred_element_type=f32)          # (TQ, S)
        s = s + mask[hi]
        s = s - jnp.max(s, axis=-1, keepdims=True)
        p = jnp.exp(s)
        p = p * pl.reciprocal(jnp.sum(p, axis=-1, keepdims=True), approx=True)

        ctx = jnp.dot(p.astype(cdt), vh, preferred_element_type=f32)        # (TQ, HD)
        attn_out = attn_out + jnp.dot(ctx.astype(cdt), wo_ref[hi],
                                      preferred_element_type=f32)           # (TQ, H)
    # TODO(synk): nn.Dropout -- identity in eval mode, training dropout not modeled.

    # --- Residual + LayerNorm 1 (f32) ----------------------------------------
    x = hq + attn_out
    mu = jnp.mean(x, axis=-1, keepdims=True)
    var = jnp.mean((x - mu) ** 2, axis=-1, keepdims=True)
    x = (x - mu) * lax.rsqrt(var + eps) * ln1_g_ref[...] + ln1_b_ref[...]

    # --- Feed-forward: up -> ReLU -> down (bf16 MXU, f32 epilogue) ------------
    u = jnp.dot(x.astype(cdt), w_up_ref[...], preferred_element_type=f32) + b_up_ref[...]
    u = jnp.maximum(u, 0.0)
    d = jnp.dot(u.astype(cdt), w_down_ref[...], preferred_element_type=f32) + b_down_ref[...]

    # --- Residual + LayerNorm 2 (f32) ----------------------------------------
    y = x + d
    mu2 = jnp.mean(y, axis=-1, keepdims=True)
    var2 = jnp.mean((y - mu2) ** 2, axis=-1, keepdims=True)
    y = (y - mu2) * lax.rsqrt(var2 + eps) * ln2_g_ref[...] + ln2_b_ref[...]

    out_ref[0] = y.astype(out_ref.dtype)


def _pick_q_tile(seq_len):
    """Largest lane/MXU-friendly query tile that divides the sequence length."""
    for t in (256, 128):
        if seq_len % t == 0:
            return t
    return seq_len


def bert_layer(h, mask, params, *, num_heads, eps, compute_dtype=jnp.bfloat16):
    B, S, H = h.shape
    NH = num_heads
    HD = H // NH
    I = params["w_up"].shape[1]
    inv_denom = 1.0 / math.sqrt(H)   # PyTorch spec: denominator = sqrt(hidden_size)
    TQ = _pick_q_tile(S)
    NT = S // TQ
    cdt = compute_dtype

    # bf16 weights feed the MXU; the output projection is pre-split per head
    # (NH, HD, H) so each head's context can be folded into it in-kernel
    # without a concatenate.
    wq = params["wq"].astype(cdt)
    wk = params["wk"].astype(cdt)
    wv = params["wv"].astype(cdt)
    wo = params["wo"].reshape(NH, HD, H).astype(cdt)
    w_up = params["w_up"].astype(cdt)
    w_down = params["w_down"].astype(cdt)

    kernel = functools.partial(bert_layer_kernel,
                               num_heads=NH, inv_denom=inv_denom, eps=eps)

    const2 = lambda b, t: (0, 0)
    const3 = lambda b, t: (0, 0, 0)

    itemsize = jnp.dtype(cdt).itemsize
    cost = pl.CostEstimate(
        flops=int(B * (4 * 2 * S * H * H + 2 * 2 * S * S * H + 2 * 2 * S * H * I)),
        transcendentals=int(B * NH * S * S),
        bytes_accessed=int((4 * H * H + 2 * H * I) * itemsize   # weights
                           + B * S * H * 4 * 2                  # hidden in + out
                           + B * NH * S * S * 4),               # additive mask
    )

    return pl.pallas_call(
        kernel,
        out_shape=jax.ShapeDtypeStruct((B, S, H), jnp.float32),
        grid=(B, NT),
        in_specs=[
            pl.BlockSpec((1, TQ, H), lambda b, t: (b, t, 0)),          # h (query tile)
            pl.BlockSpec((1, S, H), lambda b, t: (b, 0, 0)),           # h (full seq, K/V)
            pl.BlockSpec((1, NH, TQ, S), lambda b, t: (b, 0, t, 0)),   # mask (q-tile slice)
            pl.BlockSpec((H, H), const2),                              # wq
            pl.BlockSpec((H, H), const2),                              # wk
            pl.BlockSpec((H, H), const2),                              # wv
            pl.BlockSpec((NH, HD, H), const3),                         # wo (head-split)
            pl.BlockSpec((1, H), const2),                              # ln1 gamma
            pl.BlockSpec((1, H), const2),                              # ln1 beta
            pl.BlockSpec((H, I), const2),                              # w_up
            pl.BlockSpec((1, I), const2),                              # b_up
            pl.BlockSpec((I, H), const2),                              # w_down
            pl.BlockSpec((1, H), const2),                              # b_down
            pl.BlockSpec((1, H), const2),                              # ln2 gamma
            pl.BlockSpec((1, H), const2),                              # ln2 beta
        ],
        out_specs=pl.BlockSpec((1, TQ, H), lambda b, t: (b, t, 0)),
        compiler_params=pltpu.CompilerParams(
            # Every (batch, q-tile) step is independent -> shardable across
            # TensorCores (v7x megacore) and freely pipelined.
            dimension_semantics=("parallel", "parallel"),
            # Above the v5e 16 MiB scoped default; re-budget for BERT-base
            # shapes on v7x's 64 MiB physical VMEM.
            vmem_limit_bytes=32 * 1024 * 1024,
        ),
        cost_estimate=cost,
    )(h, h, mask,
      wq, wk, wv, wo,
      params["ln1_g"], params["ln1_b"],
      w_up, params["b_up"], w_down, params["b_down"],
      params["ln2_g"], params["ln2_b"])


def reference(h, mask, p, *, num_heads, eps, compute_dtype=jnp.bfloat16):
    """Pure-JAX reference mirroring the PyTorch forward (and the kernel's
    bf16-matmul / f32-accumulate precision recipe)."""
    B, S, H = h.shape
    HD = H // num_heads
    f32 = jnp.float32
    cdt = compute_dtype
    inv_denom = 1.0 / math.sqrt(H)

    wq, wk, wv = p["wq"].astype(cdt), p["wk"].astype(cdt), p["wv"].astype(cdt)
    wo = p["wo"].astype(cdt)
    w_up, w_down = p["w_up"].astype(cdt), p["w_down"].astype(cdt)

    hc = h.astype(cdt)
    q = jnp.einsum("bsh,hk->bsk", hc, wq, preferred_element_type=f32) * inv_denom
    k = jnp.einsum("bsh,hk->bsk", hc, wk, preferred_element_type=f32)
    v = jnp.einsum("bsh,hk->bsk", hc, wv, preferred_element_type=f32)

    split = lambda x: x.reshape(B, S, num_heads, HD).transpose(0, 2, 1, 3)
    qh, kh, vh = split(q).astype(cdt), split(k).astype(cdt), split(v).astype(cdt)
    scores = jnp.einsum("bnqd,bnkd->bnqk", qh, kh, preferred_element_type=f32) + mask
    scores = scores - scores.max(-1, keepdims=True)
    probs = jnp.exp(scores)
    probs = probs / probs.sum(-1, keepdims=True)
    ctx = jnp.einsum("bnqk,bnkd->bnqd", probs.astype(cdt), vh,
                     preferred_element_type=f32)
    ctx = ctx.transpose(0, 2, 1, 3).reshape(B, S, H)
    attn_out = jnp.einsum("bsh,hk->bsk", ctx.astype(cdt), wo,
                          preferred_element_type=f32)

    def ln(x, g, b):
        mu = x.mean(-1, keepdims=True)
        var = ((x - mu) ** 2).mean(-1, keepdims=True)
        return (x - mu) / jnp.sqrt(var + eps) * g + b

    x = ln(h + attn_out, p["ln1_g"][0], p["ln1_b"][0])
    u = jnp.einsum("bsh,hi->bsi", x.astype(cdt), w_up,
                   preferred_element_type=f32) + p["b_up"][0]
    u = jnp.maximum(u, 0.0)
    d = jnp.einsum("bsi,ih->bsh", u.astype(cdt), w_down,
                   preferred_element_type=f32) + p["b_down"][0]
    return ln(x + d, p["ln2_g"][0], p["ln2_b"][0])


if __name__ == "__main__":
    # Small BertConfig: hidden=32, heads=4, intermediate=64, seq=8, batch=2.
    # (Below the TPU (8,128) native tile -- fine for a correctness demo; perf
    #  conclusions only transfer at real BERT shapes.)
    B, S, H, NH, I = 2, 8, 32, 4, 64
    EPS = 1e-12

    key = jax.random.PRNGKey(0)
    ks = jax.random.split(key, 16)

    params = {
        "wq": 0.02 * jax.random.normal(ks[0], (H, H), jnp.float32),
        "wk": 0.02 * jax.random.normal(ks[1], (H, H), jnp.float32),
        "wv": 0.02 * jax.random.normal(ks[2], (H, H), jnp.float32),
        "wo": 0.02 * jax.random.normal(ks[3], (H, H), jnp.float32),
        "ln1_g": 1.0 + 0.01 * jax.random.normal(ks[4], (1, H), jnp.float32),
        "ln1_b": 0.01 * jax.random.normal(ks[5], (1, H), jnp.float32),
        "w_up": 0.02 * jax.random.normal(ks[6], (H, I), jnp.float32),
        "b_up": 0.01 * jax.random.normal(ks[7], (1, I), jnp.float32),
        "w_down": 0.02 * jax.random.normal(ks[8], (I, H), jnp.float32),
        "b_down": 0.01 * jax.random.normal(ks[9], (1, H), jnp.float32),
        "ln2_g": 1.0 + 0.01 * jax.random.normal(ks[10], (1, H), jnp.float32),
        "ln2_b": 0.01 * jax.random.normal(ks[11], (1, H), jnp.float32),
    }

    hidden_state = jax.random.normal(ks[12], (B, S, H), jnp.float32)
    attention_mask = 0.1 * jax.random.normal(ks[13], (B, NH, S, S), jnp.float32)

    out = bert_layer(hidden_state, attention_mask, params, num_heads=NH, eps=EPS)
    out = jax.block_until_ready(out)

    ref = reference(hidden_state, attention_mask, params, num_heads=NH, eps=EPS)
    assert out.shape == (B, S, H)
    err = float(jnp.max(jnp.abs(out - ref)))
    # Kernel vs. mirrored-precision reference differ only by accumulation order
    # and the EUP approximate reciprocal in the softmax.
    assert jnp.allclose(out, ref, atol=2e-3, rtol=2e-3), f"max abs err = {err}"

    print("KERNEL_OK")
</pallas_src>

<mosaic_0001>
module attributes {stable_mosaic.version = 11 : i64} {
  func.func @bert_layer_kernel(%arg0: i32, %arg1: i32, %arg2: memref<1x8x32xf32, #tpu.memory_space<vmem>>, %arg3: memref<1x8x32xf32, #tpu.memory_space<vmem>>, %arg4: memref<1x4x8x8xf32, #tpu.memory_space<vmem>>, %arg5: memref<32x32xbf16, #tpu.memory_space<vmem>>, %arg6: memref<32x32xbf16, #tpu.memory_space<vmem>>, %arg7: memref<32x32xbf16, #tpu.memory_space<vmem>>, %arg8: memref<4x8x32xbf16, #tpu.memory_space<vmem>>, %arg9: memref<1x32xf32, #tpu.memory_space<vmem>>, %arg10: memref<1x32xf32, #tpu.memory_space<vmem>>, %arg11: memref<32x64xbf16, #tpu.memory_space<vmem>>, %arg12: memref<1x64xf32, #tpu.memory_space<vmem>>, %arg13: memref<64x32xbf16, #tpu.memory_space<vmem>>, %arg14: memref<1x32xf32, #tpu.memory_space<vmem>>, %arg15: memref<1x32xf32, #tpu.memory_space<vmem>>, %arg16: memref<1x32xf32, #tpu.memory_space<vmem>>, %arg17: memref<1x8x32xf32, #tpu.memory_space<vmem>>) attributes {dimension_semantics = [#tpu.dimension_semantics<parallel>, #tpu.dimension_semantics<parallel>], iteration_bounds = array<i64: 2, 1>, scalar_prefetch = 0 : i64, scratch_operands = 0 : i64, tpu.core_type = #tpu.core_type<tc>, window_params = [{transform_indices = @transform_0, window_bounds = array<i64: 1, 8, 32>}, {transform_indices = @transform_1, window_bounds = array<i64: 1, 8, 32>}, {transform_indices = @transform_2, window_bounds = array<i64: 1, 4, 8, 8>}, {pipeline_mode = #tpu.pipeline_mode<synchronous>, transform_indices = @transform_3, window_bounds = array<i64: 32, 32>}, {pipeline_mode = #tpu.pipeline_mode<synchronous>, transform_indices = @transform_4, window_bounds = array<i64: 32, 32>}, {pipeline_mode = #tpu.pipeline_mode<synchronous>, transform_indices = @transform_5, window_bounds = array<i64: 32, 32>}, {pipeline_mode = #tpu.pipeline_mode<synchronous>, transform_indices = @transform_6, window_bounds = array<i64: 4, 8, 32>}, {pipeline_mode = #tpu.pipeline_mode<synchronous>, transform_indices = @transform_7, window_bounds = array<i64: 1, 32>}, {pipeline_mode = #tpu.pipeline_mode<synchronous>, transform_indices = @transform_8, window_bounds = array<i64: 1, 32>}, {pipeline_mode = #tpu.pipeline_mode<synchronous>, transform_indices = @transform_9, window_bounds = array<i64: 32, 64>}, {pipeline_mode = #tpu.pipeline_mode<synchronous>, transform_indices = @transform_10, window_bounds = array<i64: 1, 64>}, {pipeline_mode = #tpu.pipeline_mode<synchronous>, transform_indices = @transform_11, window_bounds = array<i64: 64, 32>}, {pipeline_mode = #tpu.pipeline_mode<synchronous>, transform_indices = @transform_12, window_bounds = array<i64: 1, 32>}, {pipeline_mode = #tpu.pipeline_mode<synchronous>, transform_indices = @transform_13, window_bounds = array<i64: 1, 32>}, {pipeline_mode = #tpu.pipeline_mode<synchronous>, transform_indices = @transform_14, window_bounds = array<i64: 1, 32>}, {transform_indices = @transform_15, window_bounds = array<i64: 1, 8, 32>}]} {
    %c0 = arith.constant 0 : index
    %c0_0 = arith.constant 0 : index
    %c0_1 = arith.constant 0 : index
    %0 = vector.load %arg2[%c0, %c0_0, %c0_1] : memref<1x8x32xf32, #tpu.memory_space<vmem>>, vector<1x8x32xf32>
    %1 = vector.shape_cast %0 : vector<1x8x32xf32> to vector<8x32xf32>
    %c0_2 = arith.constant 0 : index
    %c0_3 = arith.constant 0 : index
    %c0_4 = arith.constant 0 : index
    %2 = vector.load %arg3[%c0_2, %c0_3, %c0_4] : memref<1x8x32xf32, #tpu.memory_space<vmem>>, vector<1x8x32xf32>
    %3 = vector.shape_cast %2 : vector<1x8x32xf32> to vector<8x32xf32>
    %c0_5 = arith.constant 0 : index
    %c0_6 = arith.constant 0 : index
    %c0_7 = arith.constant 0 : index
    %c0_8 = arith.constant 0 : index
    %4 = vector.load %arg4[%c0_5, %c0_6, %c0_7, %c0_8] : memref<1x4x8x8xf32, #tpu.memory_space<vmem>>, vector<1x4x8x8xf32>
    %5 = vector.shape_cast %4 : vector<1x4x8x8xf32> to vector<4x8x8xf32>
    %6 = arith.truncf %1 : vector<8x32xf32> to vector<8x32xbf16>
    %c0_9 = arith.constant 0 : index
    %c0_10 = arith.constant 0 : index
    %7 = vector.load %arg5[%c0_9, %c0_10] : memref<32x32xbf16, #tpu.memory_space<vmem>>, vector<32x32xbf16>
    %cst = arith.constant dense<0.000000e+00> : vector<8x32xf32>
    %8 = tpu.matmul %6, %7, %cst {dimension_numbers = #tpu.dot_dimension_numbers<[1], [0], [0], [1], [0, 0, 1, 1], [], []>} : vector<8x32xbf16>, vector<32x32xbf16>, vector<8x32xf32> -> vector<8x32xf32>
    %cst_11 = arith.constant 0.176776692 : f32
    %9 = vector.broadcast %cst_11 : f32 to vector<8x32xf32>
    %10 = arith.mulf %8, %9 : vector<8x32xf32>
    %11 = arith.truncf %3 : vector<8x32xf32> to vector<8x32xbf16>
    %c0_12 = arith.constant 0 : index
    %c0_13 = arith.constant 0 : index
    %12 = vector.load %arg6[%c0_12, %c0_13] : memref<32x32xbf16, #tpu.memory_space<vmem>>, vector<32x32xbf16>
    %cst_14 = arith.constant dense<0.000000e+00> : vector<8x32xf32>
    %13 = tpu.matmul %11, %12, %cst_14 {dimension_numbers = #tpu.dot_dimension_numbers<[1], [0], [0], [1], [0, 0, 1, 1], [], []>} : vector<8x32xbf16>, vector<32x32xbf16>, vector<8x32xf32> -> vector<8x32xf32>
    %14 = arith.truncf %3 : vector<8x32xf32> to vector<8x32xbf16>
    %c0_15 = arith.constant 0 : index
    %c0_16 = arith.constant 0 : index
    %15 = vector.load %arg7[%c0_15, %c0_16] : memref<32x32xbf16, #tpu.memory_space<vmem>>, vector<32x32xbf16>
    %cst_17 = arith.constant dense<0.000000e+00> : vector<8x32xf32>
    %16 = tpu.matmul %14, %15, %cst_17 {dimension_numbers = #tpu.dot_dimension_numbers<[1], [0], [0], [1], [0, 0, 1, 1], [], []>} : vector<8x32xbf16>, vector<32x32xbf16>, vector<8x32xf32> -> vector<8x32xf32>
    %cst_18 = arith.constant 0.000000e+00 : f32
    %17 = vector.broadcast %cst_18 : f32 to vector<8x32xf32>
    %18 = vector.extract_strided_slice %10 {offsets = [0, 0], sizes = [8, 8], strides = [1, 1]} : vector<8x32xf32> to vector<8x8xf32>
    %19 = arith.truncf %18 : vector<8x8xf32> to vector<8x8xbf16>
    %20 = vector.extract_strided_slice %13 {offsets = [0, 0], sizes = [8, 8], strides = [1, 1]} : vector<8x32xf32> to vector<8x8xf32>
    %21 = arith.truncf %20 : vector<8x8xf32> to vector<8x8xbf16>
    %22 = vector.extract_strided_slice %16 {offsets = [0, 0], sizes = [8, 8], strides = [1, 1]} : vector<8x32xf32> to vector<8x8xf32>
    %23 = arith.truncf %22 : vector<8x8xf32> to vector<8x8xbf16>
    %cst_19 = arith.constant dense<0.000000e+00> : vector<8x8xf32>
    %24 = tpu.matmul %19, %21, %cst_19 {dimension_numbers = #tpu.dot_dimension_numbers<[1], [1], [0], [0], [0, 0, 1, 0], [], []>} : vector<8x8xbf16>, vector<8x8xbf16>, vector<8x8xf32> -> vector<8x8xf32>
    %25 = vector.extract_strided_slice %5 {offsets = [0, 0, 0], sizes = [1, 8, 8], strides = [1, 1, 1]} : vector<4x8x8xf32> to vector<1x8x8xf32>
    %26 = vector.shape_cast %25 : vector<1x8x8xf32> to vector<8x8xf32>
    %27 = arith.addf %24, %26 : vector<8x8xf32>
    %cst_20 = arith.constant dense<0xFF800000> : vector<8xf32>
    %28 = vector.multi_reduction <maximumf>, %27, %cst_20 [1] : vector<8x8xf32> to vector<8xf32>
    %29 = vector.shape_cast %28 : vector<8xf32> to vector<8x1xf32>
    %30 = vector.broadcast %29 : vector<8x1xf32> to vector<8x8xf32>
    %31 = arith.subf %27, %30 : vector<8x8xf32>
    %32 = math.exp %31 : vector<8x8xf32>
    %cst_21 = arith.constant dense<0.000000e+00> : vector<8xf32>
    %33 = vector.multi_reduction <add>, %32, %cst_21 [1] : vector<8x8xf32> to vector<8xf32>
    %34 = vector.shape_cast %33 : vector<8xf32> to vector<8x1xf32>
    %35 = tpu.reciprocal %34 {approx = true} : vector<8x1xf32> -> vector<8x1xf32>
    %36 = vector.broadcast %35 : vector<8x1xf32> to vector<8x8xf32>
    %37 = arith.mulf %32, %36 : vector<8x8xf32>
    %38 = arith.truncf %37 : vector<8x8xf32> to vector<8x8xbf16>
    %cst_22 = arith.constant dense<0.000000e+00> : vector<8x8xf32>
    %39 = tpu.matmul %38, %23, %cst_22 {dimension_numbers = #tpu.dot_dimension_numbers<[1], [0], [0], [1], [0, 0, 1, 1], [], []>} : vector<8x8xbf16>, vector<8x8xbf16>, vector<8x8xf32> -> vector<8x8xf32>
    %40 = arith.truncf %39 : vector<8x8xf32> to vector<8x8xbf16>
    %c0_23 = arith.constant 0 : index
    %c0_24 = arith.constant 0 : index
    %c0_25 = arith.constant 0 : index
    %41 = vector.load %arg8[%c0_23, %c0_24, %c0_25] : memref<4x8x32xbf16, #tpu.memory_space<vmem>>, vector<1x8x32xbf16>
    %42 = vector.shape_cast %41 : vector<1x8x32xbf16> to vector<8x32xbf16>
    %cst_26 = arith.constant dense<0.000000e+00> : vector<8x32xf32>
    %43 = tpu.matmul %40, %42, %cst_26 {dimension_numbers = #tpu.dot_dimension_numbers<[1], [0], [0], [1], [0, 0, 1, 1], [], []>} : vector<8x8xbf16>, vector<8x32xbf16>, vector<8x32xf32> -> vector<8x32xf32>
    %44 = arith.addf %17, %43 : vector<8x32xf32>
    %45 = vector.extract_strided_slice %10 {offsets = [0, 8], sizes = [8, 8], strides = [1, 1]} : vector<8x32xf32> to vector<8x8xf32>
    %46 = arith.truncf %45 : vector<8x8xf32> to vector<8x8xbf16>
    %47 = vector.extract_strided_slice %13 {offsets = [0, 8], sizes = [8, 8], strides = [1, 1]} : vector<8x32xf32> to vector<8x8xf32>
    %48 = arith.truncf %47 : vector<8x8xf32> to vector<8x8xbf16>
    %49 = vector.extract_strided_slice %16 {offsets = [0, 8], sizes = [8, 8], strides = [1, 1]} : vector<8x32xf32> to vector<8x8xf32>
    %50 = arith.truncf %49 : vector<8x8xf32> to vector<8x8xbf16>
    %cst_27 = arith.constant dense<0.000000e+00> : vector<8x8xf32>
    %51 = tpu.matmul %46, %48, %cst_27 {dimension_numbers = #tpu.dot_dimension_numbers<[1], [1], [0], [0], [0, 0, 1, 0], [], []>} : vector<8x8xbf16>, vector<8x8xbf16>, vector<8x8xf32> -> vector<8x8xf32>
    %52 = vector.extract_strided_slice %5 {offsets = [1, 0, 0], sizes = [1, 8, 8], strides = [1, 1, 1]} : vector<4x8x8xf32> to vector<1x8x8xf32>
    %53 = vector.shape_cast %52 : vector<1x8x8xf32> to vector<8x8xf32>
    %54 = arith.addf %51, %53 : vector<8x8xf32>
    %cst_28 = arith.constant dense<0xFF800000> : vector<8xf32>
    %55 = vector.multi_reduction <maximumf>, %54, %cst_28 [1] : vector<8x8xf32> to vector<8xf32>
    %56 = vector.shape_cast %55 : vector<8xf32> to vector<8x1xf32>
    %57 = vector.broadcast %56 : vector<8x1xf32> to vector<8x8xf32>
    %58 = arith.subf %54, %57 : vector<8x8xf32>
    %59 = math.exp %58 : vector<8x8xf32>
    %cst_29 = arith.constant dense<0.000000e+00> : vector<8xf32>
    %60 = vector.multi_reduction <add>, %59, %cst_29 [1] : vector<8x8xf32> to vector<8xf32>
    %61 = vector.shape_cast %60 : vector<8xf32> to vector<8x1xf32>
    %62 = tpu.reciprocal %61 {approx = true} : vector<8x1xf32> -> vector<8x1xf32>
    %63 = vector.broadcast %62 : vector<8x1xf32> to vector<8x8xf32>
    %64 = arith.mulf %59, %63 : vector<8x8xf32>
    %65 = arith.truncf %64 : vector<8x8xf32> to vector<8x8xbf16>
    %cst_30 = arith.constant dense<0.000000e+00> : vector<8x8xf32>
    %66 = tpu.matmul %65, %50, %cst_30 {dimension_numbers = #tpu.dot_dimension_numbers<[1], [0], [0], [1], [0, 0, 1, 1], [], []>} : vector<8x8xbf16>, vector<8x8xbf16>, vector<8x8xf32> -> vector<8x8xf32>
    %67 = arith.truncf %66 : vector<8x8xf32> to vector<8x8xbf16>
    %c1 = arith.constant 1 : index
    %c0_31 = arith.constant 0 : index
    %c0_32 = arith.constant 0 : index
    %68 = vector.load %arg8[%c1, %c0_31, %c0_32] : memref<4x8x32xbf16, #tpu.memory_space<vmem>>, vector<1x8x32xbf16>
    %69 = vector.shape_cast %68 : vector<1x8x32xbf16> to vector<8x32xbf16>
    %cst_33 = arith.constant dense<0.000000e+00> : vector<8x32xf32>
    %70 = tpu.matmul %67, %69, %cst_33 {dimension_numbers = #tpu.dot_dimension_numbers<[1], [0], [0], [1], [0, 0, 1, 1], [], []>} : vector<8x8xbf16>, vector<8x32xbf16>, vector<8x32xf32> -> vector<8x32xf32>
    %71 = arith.addf %44, %70 : vector<8x32xf32>
    %72 = vector.extract_strided_slice %10 {offsets = [0, 16], sizes = [8, 8], strides = [1, 1]} : vector<8x32xf32> to vector<8x8xf32>
    %73 = arith.truncf %72 : vector<8x8xf32> to vector<8x8xbf16>
    %74 = vector.extract_strided_slice %13 {offsets = [0, 16], sizes = [8, 8], strides = [1, 1]} : vector<8x32xf32> to vector<8x8xf32>
    %75 = arith.truncf %74 : vector<8x8xf32> to vector<8x8xbf16>
    %76 = vector.extract_strided_slice %16 {offsets = [0, 16], sizes = [8, 8], strides = [1, 1]} : vector<8x32xf32> to vector<8x8xf32>
    %77 = arith.truncf %76 : vector<8x8xf32> to vector<8x8xbf16>
    %cst_34 = arith.constant dense<0.000000e+00> : vector<8x8xf32>
    %78 = tpu.matmul %73, %75, %cst_34 {dimension_numbers = #tpu.dot_dimension_numbers<[1], [1], [0], [0], [0, 0, 1, 0], [], []>} : vector<8x8xbf16>, vector<8x8xbf16>, vector<8x8xf32> -> vector<8x8xf32>
    %79 = vector.extract_strided_slice %5 {offsets = [2, 0, 0], sizes = [1, 8, 8], strides = [1, 1, 1]} : vector<4x8x8xf32> to vector<1x8x8xf32>
    %80 = vector.shape_cast %79 : vector<1x8x8xf32> to vector<8x8xf32>
    %81 = arith.addf %78, %80 : vector<8x8xf32>
    %cst_35 = arith.constant dense<0xFF800000> : vector<8xf32>
    %82 = vector.multi_reduction <maximumf>, %81, %cst_35 [1] : vector<8x8xf32> to vector<8xf32>
    %83 = vector.shape_cast %82 : vector<8xf32> to vector<8x1xf32>
    %84 = vector.broadcast %83 : vector<8x1xf32> to vector<8x8xf32>
    %85 = arith.subf %81, %84 : vector<8x8xf32>
    %86 = math.exp %85 : vector<8x8xf32>
    %cst_36 = arith.constant dense<0.000000e+00> : vector<8xf32>
    %87 = vector.multi_reduction <add>, %86, %cst_36 [1] : vector<8x8xf32> to vector<8xf32>
    %88 = vector.shape_cast %87 : vector<8xf32> to vector<8x1xf32>
    %89 = tpu.reciprocal %88 {approx = true} : vector<8x1xf32> -> vector<8x1xf32>
    %90 = vector.broadcast %89 : vector<8x1xf32> to vector<8x8xf32>
    %91 = arith.mulf %86, %90 : vector<8x8xf32>
    %92 = arith.truncf %91 : vector<8x8xf32> to vector<8x8xbf16>
    %cst_37 = arith.constant dense<0.000000e+00> : vector<8x8xf32>
    %93 = tpu.matmul %92, %77, %cst_37 {dimension_numbers = #tpu.dot_dimension_numbers<[1], [0], [0], [1], [0, 0, 1, 1], [], []>} : vector<8x8xbf16>, vector<8x8xbf16>, vector<8x8xf32> -> vector<8x8xf32>
    %94 = arith.truncf %93 : vector<8x8xf32> to vector<8x8xbf16>
    %c2 = arith.constant 2 : index
    %c0_38 = arith.constant 0 : index
    %c0_39 = arith.constant 0 : index
    %95 = vector.load %arg8[%c2, %c0_38, %c0_39] : memref<4x8x32xbf16, #tpu.memory_space<vmem>>, vector<1x8x32xbf16>
    %96 = vector.shape_cast %95 : vector<1x8x32xbf16> to vector<8x32xbf16>
    %cst_40 = arith.constant dense<0.000000e+00> : vector<8x32xf32>
    %97 = tpu.matmul %94, %96, %cst_40 {dimension_numbers = #tpu.dot_dimension_numbers<[1], [0], [0], [1], [0, 0, 1, 1], [], []>} : vector<8x8xbf16>, vector<8x32xbf16>, vector<8x32xf32> -> vector<8x32xf32>
    %98 = arith.addf %71, %97 : vector<8x32xf32>
    %99 = vector.extract_strided_slice %10 {offsets = [0, 24], sizes = [8, 8], strides = [1, 1]} : vector<8x32xf32> to vector<8x8xf32>
    %100 = arith.truncf %99 : vector<8x8xf32> to vector<8x8xbf16>
    %101 = vector.extract_strided_slice %13 {offsets = [0, 24], sizes = [8, 8], strides = [1, 1]} : vector<8x32xf32> to vector<8x8xf32>
    %102 = arith.truncf %101 : vector<8x8xf32> to vector<8x8xbf16>
    %103 = vector.extract_strided_slice %16 {offsets = [0, 24], sizes = [8, 8], strides = [1, 1]} : vector<8x32xf32> to vector<8x8xf32>
    %104 = arith.truncf %103 : vector<8x8xf32> to vector<8x8xbf16>
    %cst_41 = arith.constant dense<0.000000e+00> : vector<8x8xf32>
    %105 = tpu.matmul %100, %102, %cst_41 {dimension_numbers = #tpu.dot_dimension_numbers<[1], [1], [0], [0], [0, 0, 1, 0], [], []>} : vector<8x8xbf16>, vector<8x8xbf16>, vector<8x8xf32> -> vector<8x8xf32>
    %106 = vector.extract_strided_slice %5 {offsets = [3, 0, 0], sizes = [1, 8, 8], strides = [1, 1, 1]} : vector<4x8x8xf32> to vector<1x8x8xf32>
    %107 = vector.shape_cast %106 : vector<1x8x8xf32> to vector<8x8xf32>
    %108 = arith.addf %105, %107 : vector<8x8xf32>
    %cst_42 = arith.constant dense<0xFF800000> : vector<8xf32>
    %109 = vector.multi_reduction <maximumf>, %108, %cst_42 [1] : vector<8x8xf32> to vector<8xf32>
    %110 = vector.shape_cast %109 : vector<8xf32> to vector<8x1xf32>
    %111 = vector.broadcast %110 : vector<8x1xf32> to vector<8x8xf32>
    %112 = arith.subf %108, %111 : vector<8x8xf32>
    %113 = math.exp %112 : vector<8x8xf32>
    %cst_43 = arith.constant dense<0.000000e+00> : vector<8xf32>
    %114 = vector.multi_reduction <add>, %113, %cst_43 [1] : vector<8x8xf32> to vector<8xf32>
    %115 = vector.shape_cast %114 : vector<8xf32> to vector<8x1xf32>
    %116 = tpu.reciprocal %115 {approx = true} : vector<8x1xf32> -> vector<8x1xf32>
    %117 = vector.broadcast %116 : vector<8x1xf32> to vector<8x8xf32>
    %118 = arith.mulf %113, %117 : vector<8x8xf32>
    %119 = arith.truncf %118 : vector<8x8xf32> to vector<8x8xbf16>
    %cst_44 = arith.constant dense<0.000000e+00> : vector<8x8xf32>
    %120 = tpu.matmul %119, %104, %cst_44 {dimension_numbers = #tpu.dot_dimension_numbers<[1], [0], [0], [1], [0, 0, 1, 1], [], []>} : vector<8x8xbf16>, vector<8x8xbf16>, vector<8x8xf32> -> vector<8x8xf32>
    %121 = arith.truncf %120 : vector<8x8xf32> to vector<8x8xbf16>
    %c3 = arith.constant 3 : index
    %c0_45 = arith.constant 0 : index
    %c0_46 = arith.constant 0 : index
    %122 = vector.load %arg8[%c3, %c0_45, %c0_46] : memref<4x8x32xbf16, #tpu.memory_space<vmem>>, vector<1x8x32xbf16>
    %123 = vector.shape_cast %122 : vector<1x8x32xbf16> to vector<8x32xbf16>
    %cst_47 = arith.constant dense<0.000000e+00> : vector<8x32xf32>
    %124 = tpu.matmul %121, %123, %cst_47 {dimension_numbers = #tpu.dot_dimension_numbers<[1], [0], [0], [1], [0, 0, 1, 1], [], []>} : vector<8x8xbf16>, vector<8x32xbf16>, vector<8x32xf32> -> vector<8x32xf32>
    %125 = arith.addf %98, %124 : vector<8x32xf32>
    %126 = arith.addf %1, %125 : vector<8x32xf32>
    %cst_48 = arith.constant dense<0.000000e+00> : vector<8xf32>
    %127 = vector.multi_reduction <add>, %126, %cst_48 [1] : vector<8x32xf32> to vector<8xf32>
    %128 = vector.shape_cast %127 : vector<8xf32> to vector<8x1xf32>
    %cst_49 = arith.constant 3.200000e+01 : f32
    %129 = vector.broadcast %cst_49 : f32 to vector<8x1xf32>
    %130 = arith.divf %128, %129 : vector<8x1xf32>
    %131 = vector.broadcast %130 : vector<8x1xf32> to vector<8x32xf32>
    %132 = arith.subf %126, %131 : vector<8x32xf32>
    %133 = arith.mulf %132, %132 : vector<8x32xf32>
    %cst_50 = arith.constant dense<0.000000e+00> : vector<8xf32>
    %134 = vector.multi_reduction <add>, %133, %cst_50 [1] : vector<8x32xf32> to vector<8xf32>
    %135 = vector.shape_cast %134 : vector<8xf32> to vector<8x1xf32>
    %cst_51 = arith.constant 3.200000e+01 : f32
    %136 = vector.broadcast %cst_51 : f32 to vector<8x1xf32>
    %137 = arith.divf %135, %136 : vector<8x1xf32>
    %138 = vector.broadcast %130 : vector<8x1xf32> to vector<8x32xf32>
    %139 = arith.subf %126, %138 : vector<8x32xf32>
    %cst_52 = arith.constant 9.99999996E-13 : f32
    %140 = vector.broadcast %cst_52 : f32 to vector<8x1xf32>
    %141 = arith.addf %137, %140 : vector<8x1xf32>
    %142 = math.rsqrt %141 : vector<8x1xf32>
    %143 = vector.broadcast %142 : vector<8x1xf32> to vector<8x32xf32>
    %144 = arith.mulf %139, %143 : vector<8x32xf32>
    %c0_53 = arith.constant 0 : index
    %c0_54 = arith.constant 0 : index
    %145 = vector.load %arg9[%c0_53, %c0_54] : memref<1x32xf32, #tpu.memory_space<vmem>>, vector<1x32xf32>
    %146 = vector.broadcast %145 : vector<1x32xf32> to vector<8x32xf32>
    %147 = arith.mulf %144, %146 : vector<8x32xf32>
    %c0_55 = arith.constant 0 : index
    %c0_56 = arith.constant 0 : index
    %148 = vector.load %arg10[%c0_55, %c0_56] : memref<1x32xf32, #tpu.memory_space<vmem>>, vector<1x32xf32>
    %149 = vector.broadcast %148 : vector<1x32xf32> to vector<8x32xf32>
    %150 = arith.addf %147, %149 : vector<8x32xf32>
    %151 = arith.truncf %150 : vector<8x32xf32> to vector<8x32xbf16>
    %c0_57 = arith.constant 0 : index
    %c0_58 = arith.constant 0 : index
    %152 = vector.load %arg11[%c0_57, %c0_58] : memref<32x64xbf16, #tpu.memory_space<vmem>>, vector<32x64xbf16>
    %cst_59 = arith.constant dense<0.000000e+00> : vector<8x64xf32>
    %153 = tpu.matmul %151, %152, %cst_59 {dimension_numbers = #tpu.dot_dimension_numbers<[1], [0], [0], [1], [0, 0, 1, 1], [], []>} : vector<8x32xbf16>, vector<32x64xbf16>, vector<8x64xf32> -> vector<8x64xf32>
    %c0_60 = arith.constant 0 : index
    %c0_61 = arith.constant 0 : index
    %154 = vector.load %arg12[%c0_60, %c0_61] : memref<1x64xf32, #tpu.memory_space<vmem>>, vector<1x64xf32>
    %155 = vector.broadcast %154 : vector<1x64xf32> to vector<8x64xf32>
    %156 = arith.addf %153, %155 : vector<8x64xf32>
    %cst_62 = arith.constant 0.000000e+00 : f32
    %157 = vector.broadcast %cst_62 : f32 to vector<8x64xf32>
    %158 = arith.maximumf %156, %157 : vector<8x64xf32>
    %159 = arith.truncf %158 : vector<8x64xf32> to vector<8x64xbf16>
    %c0_63 = arith.constant 0 : index
    %c0_64 = arith.constant 0 : index
    %160 = vector.load %arg13[%c0_63, %c0_64] : memref<64x32xbf16, #tpu.memory_space<vmem>>, vector<64x32xbf16>
    %cst_65 = arith.constant dense<0.000000e+00> : vector<8x32xf32>
    %161 = tpu.matmul %159, %160, %cst_65 {dimension_numbers = #tpu.dot_dimension_numbers<[1], [0], [0], [1], [0, 0, 1, 1], [], []>} : vector<8x64xbf16>, vector<64x32xbf16>, vector<8x32xf32> -> vector<8x32xf32>
    %c0_66 = arith.constant 0 : index
    %c0_67 = arith.constant 0 : index
    %162 = vector.load %arg14[%c0_66, %c0_67] : memref<1x32xf32, #tpu.memory_space<vmem>>, vector<1x32xf32>
    %163 = vector.broadcast %162 : vector<1x32xf32> to vector<8x32xf32>
    %164 = arith.addf %161, %163 : vector<8x32xf32>
    %165 = arith.addf %150, %164 : vector<8x32xf32>
    %cst_68 = arith.constant dense<0.000000e+00> : vector<8xf32>
    %166 = vector.multi_reduction <add>, %165, %cst_68 [1] : vector<8x32xf32> to vector<8xf32>
    %167 = vector.shape_cast %166 : vector<8xf32> to vector<8x1xf32>
    %cst_69 = arith.constant 3.200000e+01 : f32
    %168 = vector.broadcast %cst_69 : f32 to vector<8x1xf32>
    %169 = arith.divf %167, %168 : vector<8x1xf32>
    %170 = vector.broadcast %169 : vector<8x1xf32> to vector<8x32xf32>
    %171 = arith.subf %165, %170 : vector<8x32xf32>
    %172 = arith.mulf %171, %171 : vector<8x32xf32>
    %cst_70 = arith.constant dense<0.000000e+00> : vector<8xf32>
    %173 = vector.multi_reduction <add>, %172, %cst_70 [1] : vector<8x32xf32> to vector<8xf32>
    %174 = vector.shape_cast %173 : vector<8xf32> to vector<8x1xf32>
    %cst_71 = arith.constant 3.200000e+01 : f32
    %175 = vector.broadcast %cst_71 : f32 to vector<8x1xf32>
    %176 = arith.divf %174, %175 : vector<8x1xf32>
    %177 = vector.broadcast %169 : vector<8x1xf32> to vector<8x32xf32>
    %178 = arith.subf %165, %177 : vector<8x32xf32>
    %cst_72 = arith.constant 9.99999996E-13 : f32
    %179 = vector.broadcast %cst_72 : f32 to vector<8x1xf32>
    %180 = arith.addf %176, %179 : vector<8x1xf32>
    %181 = math.rsqrt %180 : vector<8x1xf32>
    %182 = vector.broadcast %181 : vector<8x1xf32> to vector<8x32xf32>
    %183 = arith.mulf %178, %182 : vector<8x32xf32>
    %c0_73 = arith.constant 0 : index
    %c0_74 = arith.constant 0 : index
    %184 = vector.load %arg15[%c0_73, %c0_74] : memref<1x32xf32, #tpu.memory_space<vmem>>, vector<1x32xf32>
    %185 = vector.broadcast %184 : vector<1x32xf32> to vector<8x32xf32>
    %186 = arith.mulf %183, %185 : vector<8x32xf32>
    %c0_75 = arith.constant 0 : index
    %c0_76 = arith.constant 0 : index
    %187 = vector.load %arg16[%c0_75, %c0_76] : memref<1x32xf32, #tpu.memory_space<vmem>>, vector<1x32xf32>
    %188 = vector.broadcast %187 : vector<1x32xf32> to vector<8x32xf32>
    %189 = arith.addf %186, %188 : vector<8x32xf32>
    %c0_77 = arith.constant 0 : index
    %c0_78 = arith.constant 0 : index
    %c0_79 = arith.constant 0 : index
    %190 = vector.load %arg17[%c0_77, %c0_78, %c0_79] : memref<1x8x32xf32, #tpu.memory_space<vmem>>, vector<1x8x32xf32>
    %191 = vector.shape_cast %190 : vector<1x8x32xf32> to vector<8x32xf32>
    %192 = vector.shape_cast %189 : vector<8x32xf32> to vector<1x8x32xf32>
    tpu.vector_store %arg17[%c0_77, %c0_78, %c0_79], %192 {strides = array<i32>} : memref<1x8x32xf32, #tpu.memory_space<vmem>>, vector<1x8x32xf32>,
    return
  }
  func.func @transform_0(%arg0: i32, %arg1: i32) -> (i32, i32, i32) {
    %c0_i32 = arith.constant 0 : i32
    %c0_i32_0 = arith.constant 0 : i32
    return %arg0, %arg1, %c0_i32 : i32, i32, i32
  }
  func.func @transform_1(%arg0: i32, %arg1: i32) -> (i32, i32, i32) {
    %c0_i32 = arith.constant 0 : i32
    %c0_i32_0 = arith.constant 0 : i32
    %c0_i32_1 = arith.constant 0 : i32
    return %arg0, %c0_i32, %c0_i32_0 : i32, i32, i32
  }
  func.func @transform_2(%arg0: i32, %arg1: i32) -> (i32, i32, i32, i32) {
    %c0_i32 = arith.constant 0 : i32
    %c0_i32_0 = arith.constant 0 : i32
    %c0_i32_1 = arith.constant 0 : i32
    return %arg0, %c0_i32, %arg1, %c0_i32_0 : i32, i32, i32, i32
  }
  func.func @transform_3(%arg0: i32, %arg1: i32) -> (i32, i32) {
    %c0_i32 = arith.constant 0 : i32
    %c0_i32_0 = arith.constant 0 : i32
    %c0_i32_1 = arith.constant 0 : i32
    return %c0_i32, %c0_i32_0 : i32, i32
  }
  func.func @transform_4(%arg0: i32, %arg1: i32) -> (i32, i32) {
    %c0_i32 = arith.constant 0 : i32
    %c0_i32_0 = arith.constant 0 : i32
    %c0_i32_1 = arith.constant 0 : i32
    return %c0_i32, %c0_i32_0 : i32, i32
  }
  func.func @transform_5(%arg0: i32, %arg1: i32) -> (i32, i32) {
    %c0_i32 = arith.constant 0 : i32
    %c0_i32_0 = arith.constant 0 : i32
    %c0_i32_1 = arith.constant 0 : i32
    return %c0_i32, %c0_i32_0 : i32, i32
  }
  func.func @transform_6(%arg0: i32, %arg1: i32) -> (i32, i32, i32) {
    %c0_i32 = arith.constant 0 : i32
    %c0_i32_0 = arith.constant 0 : i32
    %c0_i32_1 = arith.constant 0 : i32
    %c0_i32_2 = arith.constant 0 : i32
    return %c0_i32, %c0_i32_0, %c0_i32_1 : i32, i32, i32
  }
  func.func @transform_7(%arg0: i32, %arg1: i32) -> (i32, i32) {
    %c0_i32 = arith.constant 0 : i32
    %c0_i32_0 = arith.constant 0 : i32
    %c0_i32_1 = arith.constant 0 : i32
    return %c0_i32, %c0_i32_0 : i32, i32
  }
  func.func @transform_8(%arg0: i32, %arg1: i32) -> (i32, i32) {
    %c0_i32 = arith.constant 0 : i32
    %c0_i32_0 = arith.constant 0 : i32
    %c0_i32_1 = arith.constant 0 : i32
    return %c0_i32, %c0_i32_0 : i32, i32
  }
  func.func @transform_9(%arg0: i32, %arg1: i32) -> (i32, i32) {
    %c0_i32 = arith.constant 0 : i32
    %c0_i32_0 = arith.constant 0 : i32
    %c0_i32_1 = arith.constant 0 : i32
    return %c0_i32, %c0_i32_0 : i32, i32
  }
  func.func @transform_10(%arg0: i32, %arg1: i32) -> (i32, i32) {
    %c0_i32 = arith.constant 0 : i32
    %c0_i32_0 = arith.constant 0 : i32
    %c0_i32_1 = arith.constant 0 : i32
    return %c0_i32, %c0_i32_0 : i32, i32
  }
  func.func @transform_11(%arg0: i32, %arg1: i32) -> (i32, i32) {
    %c0_i32 = arith.constant 0 : i32
    %c0_i32_0 = arith.constant 0 : i32
    %c0_i32_1 = arith.constant 0 : i32
    return %c0_i32, %c0_i32_0 : i32, i32
  }
  func.func @transform_12(%arg0: i32, %arg1: i32) -> (i32, i32) {
    %c0_i32 = arith.constant 0 : i32
    %c0_i32_0 = arith.constant 0 : i32
    %c0_i32_1 = arith.constant 0 : i32
    return %c0_i32, %c0_i32_0 : i32, i32
  }
  func.func @transform_13(%arg0: i32, %arg1: i32) -> (i32, i32) {
    %c0_i32 = arith.constant 0 : i32
    %c0_i32_0 = arith.constant 0 : i32
    %c0_i32_1 = arith.constant 0 : i32
    return %c0_i32, %c0_i32_0 : i32, i32
  }
  func.func @transform_14(%arg0: i32, %arg1: i32) -> (i32, i32) {
    %c0_i32 = arith.constant 0 : i32
    %c0_i32_0 = arith.constant 0 : i32
    %c0_i32_1 = arith.constant 0 : i32
    return %c0_i32, %c0_i32_0 : i32, i32
  }
  func.func @transform_15(%arg0: i32, %arg1: i32) -> (i32, i32, i32) {
    %c0_i32 = arith.constant 0 : i32
    %c0_i32_0 = arith.constant 0 : i32
    return %arg0, %arg1, %c0_i32 : i32, i32, i32
  }
}

</mosaic_0001>

<bundles_post_ra>
// kernel: tpu_custom_call.1
= control target key start
LH: loop header
LB: loop body
LE: loop exit
PB: predicated region body
PF: predicated region fallthrough
CT: control target
= control target key end

     0   :  { %s2901_s0 = inlined_call_operand.vmem [shape: f32[2,8,32], index: 0, kind: input, shape index: {}]   ;;  %s2902_s1 = inlined_call_operand.vmem [shape: f32[2,8,32], index: 1, kind: input, shape index: {}]   ;;  %s2903_s2 = inlined_call_operand.hbm [shape: f32[2,4,8,8], index: 2, kind: input, shape index: {}]   ;;  %s2904_s3 = inlined_call_operand.vmem [shape: bf16[32,32], index: 3, kind: input, shape index: {}]   ;;  %s2905_s4 = inlined_call_operand.hbm [shape: bf16[32,32], index: 4, kind: input, shape index: {}]   ;;  %s2906_s5 = inlined_call_operand.hbm [shape: bf16[32,32], index: 5, kind: input, shape index: {}]   ;;  %s2907_s6 = inlined_call_operand.hbm [shape: bf16[4,8,32], index: 6, kind: input, shape index: {}]   ;;  %s2908_s7 = inlined_call_operand.vmem [shape: f32[1,32], index: 7, kind: input, shape index: {}]   ;;  %s2909_s8 = inlined_call_operand.vmem [shape: f32[1,32], index: 8, kind: input, shape index: {}]   ;;  %s2910_s9 = inlined_call_operand.hbm [shape: bf16[32,64], index: 9, kind: input, shape index: {}]   ;;  %s2911_s10 = inlined_call_operand.vmem [shape: f32[1,64], index: 10, kind: input, shape index: {}]   ;;  %s2912_s11 = inlined_call_operand.vmem [shape: bf16[64,32], index: 11, kind: input, shape index: {}]   ;;  %s2913_s12 = inlined_call_operand.vmem [shape: f32[1,32], index: 12, kind: input, shape index: {}]   ;;  %s2914_s13 = inlined_call_operand.vmem [shape: f32[1,32], index: 13, kind: input, shape index: {}]   ;;  %s2915_s14 = inlined_call_operand.vmem [shape: f32[1,32], index: 14, kind: input, shape index: {}]   ;;  %s2916_s15 = inlined_call_operand.hbm [shape: f32[2,8,32], index: 15, kind: output, shape index: {}]  }
   0x1   :  { %2920 = sst [smem:[#allocation18_spill]] %s2905_s4 }
   0x2   :  { %2921 = sst [smem:[#allocation19_spill]] %s2906_s5 }
   0x3   :  { %2922 = sst [smem:[#allocation20_spill]] %s2907_s6 }
   0x4   :  { %2923 = sst [smem:[#allocation21_spill]] %s2910_s9 }
   0x5   :  { %2924 = sst [smem:[#allocation22_spill]] %s2911_s10 }
   0x6   :  { %2925 = sst [smem:[#allocation23_spill]] %s2913_s12 }
   0x7   :  { %2926 = sst [smem:[#allocation24_spill]] %s2914_s13 }
   0x8   :  { %2927 = sst [smem:[#allocation25_spill]] %s2915_s14 }
   0x9   :  { %2928 = sst [smem:[#allocation26_spill]] %s2916_s15 }
   0xa   :  { %20 = vsyncpa [#allocation3], 0 }
   0xb   :  { %22 = vsyncpa [#allocation3 + $0x1], 0 }
   0xc   :  { %23 = vsyncpa [#allocation6], 0 }
   0xd   :  { %24 = vsyncpa [#allocation9], 0 }
   0xe   :  { %25 = vsyncpa [#allocation4], 0 }
   0xf   :  { %27 = vsyncpa [#allocation4 + $0x1], 0  ;;  %s2510_s18 = smov 0   ;;  %s2512_s19 = smov 0  }
  0x10   :  { %s2514_s20 = smov 0   ;;  %s2516_s21 = smov 0  }
  0x11   :  { %s2518_s22 = smov 0   ;;  %s2520_s23 = smov 0  }
  0x12 LB: > { %2929 = sst [smem:[#allocation16_spill]] %s2393_s18  ;;  %s1832_s24 = sadd.s32 4294967295, %s2413_s23   ;;  %s2413_s23 = sphi %s2520_s23, %s33_s23   ;;  %s2409_s22 = sphi %s2518_s22, %s2956_s22   ;;  %s2405_s21 = sphi %s2516_s21, %s2955_s21   ;;  %s2401_s20 = sphi %s2514_s20, %s2954_s20   ;;  %s2397_s19 = sphi %s2512_s19, %s2953_s19   ;;  %s2393_s18 = sphi %s2510_s18, %s2952_s18  }
  0x13   : > { %s1833_s25 = sadd.s32 4294967294, %s2413_s23   ;;  %p121_p0 = scmp.ne.s32.totalorder %s2397_s19, %s2393_s18 }
  0x14   : > { %p2544_p1 = scmp.eq.s32.totalorder %s1832_s24, 0  ;;  %p2548_p2 = scmp.eq.s32.totalorder %s1832_s24, 1 }
  0x15   : > { %p405_p3 = scmp.eq.s32.totalorder %s1833_s25, 1  ;;  %p1834_p5 = scmp.ge.s32.totalorder %s2413_s23, 1 }
  0x16   : > { %p2554_p4 = por %p2544_p1, %p121_p0  ;;  %p412_p7 = scmp.lt.s32.totalorder %s2413_s23, 3 }
  0x17   : > { %p2559_p6 = por %p405_p3, %p121_p0  ;;  %s2415_s16 = smov [#allocation5]  }
  0x18   : > { %p2564_p8 = pnand %p1834_p5, %p412_p7  ;;  %s427_s17 = sshll.u32 %s2415_s16, 4  ;;  %s428_s17 = int_to_ptr.vmem [resolvable:$true] %s427_s17 }
  0x19   : > { %s2933_s29 = scalar_select %p2559_p6, 1, 0 }
  0x1a   : > { %p2069_p9 = pneg %p2564_p8  ;;  %s2416_s25 = smov [#allocation8]  }
  0x1b   : > { %2934 = sst [smem:[#allocation17_spill]] %s2933_s29  ;;  %s453_s29 = sshll.u32 %s2416_s25, 4  ;;  %s454_s29 = int_to_ptr.vmem [resolvable:$true] %s453_s29 }
  0x1c   : > { %p2573_p11 = pnand %p2069_p9, %p2544_p1  ;;  %s2417_s18 = smov [#allocation7]  }
  0x1d   : > { %s440_s15 = sshll.u32 %s2417_s18, 4  ;;  %s2204_s14 = scalar_lea.vmem %s428_s17, 256  ;;  %s441_s15 = int_to_ptr.vmem [resolvable:$true] %s440_s15 }
  0x1e   : > { %p2195_p12 = pneg %p2573_p11  ;;  %p2205_p13 = scmp.ne.s32.totalorder %s428_s17, %s2204_s14 }
  0x1f   : > { %p2212_p5 = scmp.lt.s32.totalorder %s428_s17, %s428_s17  ;;  %p2213_p7 = scmp.lt.s32.totalorder %s2204_s14, %s2204_s14 }
  0x20   : > { %p2207_p0 = pnand %p2205_p13, %p2195_p12 }
  0x21   : > { %p2214_p9 = por %p2213_p7, %p2212_p5 }
  0x22   : > { %p2208_p3 = pneg %p2207_p0 }
  0x24   : > { %p2215_p10 = pnand %p2214_p9, %p2208_p3 }
  0x26   : > { %2218 = shalt.err (!%p2215_p10)
}
  0x27   : > { %s2418_s16 = smov 64   ;;  %s2419_s25 = smov 4  }
  0x28   : > { %s2937_s4 = sld [smem:[#allocation18_spill]]  ;;  %s2230_s12 = scalar_lea.vmem %s454_s29, 256 }
  0x29   : > { %p2231_p13 = scmp.ne.s32.totalorder %s454_s29, %s2230_s12  ;;  %p2238_p3 = scmp.lt.s32.totalorder %s454_s29, %s454_s29 }
  0x2a   : > { %p2239_p10 = scmp.lt.s32.totalorder %s2230_s12, %s2230_s12 }
  0x2b   : > { %p2233_p0 = pnand %p2231_p13, %p2195_p12 }
  0x2c   : > { %p2240_p7 = por %p2239_p10, %p2238_p3 }
  0x2d   : > { %p2234_p5 = pneg %p2233_p0 }
  0x2e   : > { %2072 = dma.hbm_to_vmem [thread:$0]  (!%p2573_p11), %s2937_s4, 256, %s428_s17, [#allocation6], %s2418_s16, %s2418_s16, %s2419_s25  }
  0x2f   : > { %p2241_p9 = pnand %p2240_p7, %p2234_p5 }
  0x31   : > { %2244 = shalt.err (!%p2241_p9)
}
  0x32   : > { %s2938_s6 = sld [smem:[#allocation20_spill]]  ;;  %s2256_s13 = scalar_lea.vmem %s441_s15, 256 }
  0x33   : > { %p2257_p6 = scmp.ne.s32.totalorder %s441_s15, %s2256_s13  ;;  %p2264_p3 = scmp.lt.s32.totalorder %s441_s15, %s441_s15 }
  0x34   : > { %p2265_p5 = scmp.lt.s32.totalorder %s2256_s13, %s2256_s13 }
  0x35   : > { %p2259_p13 = pnand %p2257_p6, %p2195_p12 }
  0x36   : > { %p2266_p10 = por %p2265_p5, %p2264_p3 }
  0x37   : > { %p2260_p0 = pneg %p2259_p13 }
  0x38   : > { %2078 = dma.hbm_to_vmem [thread:$0]  (!%p2573_p11), %s2938_s6, 256, %s454_s29, [#allocation9], %s2418_s16, %s2418_s16, %s2419_s25  }
  0x39   : > { %p2267_p7 = pnand %p2266_p10, %p2260_p0 }
  0x3b   : > { %2270 = shalt.err (!%p2267_p7)
}
  0x3c   : > { %s2939_s5 = sld [smem:[#allocation19_spill]]  ;;  %s2420_s29 = smov [#allocation10]  }
  0x3d   : > { %s472_s17 = sshll.u32 %s2420_s29, 4  ;;  %s473_s17 = int_to_ptr.vmem [resolvable:$true] %s472_s17 }
  0x3e   : > { %s2282_s18 = scalar_lea.vmem %s473_s17, 256  ;;  %p2290_p0 = scmp.lt.s32.totalorder %s473_s17, %s473_s17 }
  0x3f   : > { %p2283_p6 = scmp.ne.s32.totalorder %s473_s17, %s2282_s18  ;;  %p2291_p3 = scmp.lt.s32.totalorder %s2282_s18, %s2282_s18 }
  0x41   : > { %p2285_p9 = pnand %p2283_p6, %p2195_p12  ;;  %p2292_p5 = por %p2291_p3, %p2290_p0 }
  0x42   : > { %2075 = dma.hbm_to_vmem [thread:$0]  (!%p2573_p11), %s2939_s5, 256, %s441_s15, [#allocation6], %s2418_s16, %s2418_s16, %s2419_s25  }
  0x43   : > { %p2286_p13 = pneg %p2285_p9 }
  0x45   : > { %p2293_p10 = pnand %p2292_p5, %p2286_p13 }
  0x47   : > { %2296 = shalt.err (!%p2293_p10)
}
  0x48   : > { %s2940_s9 = sld [smem:[#allocation21_spill]]  ;;  %s45_s13 = sadd.s32 1, %s2409_s22 }
  0x49   : > { %s108_s24 = sadd.s32 1, %s2401_s20  ;;  %p47_p12 = scmp.ge.s32.totalorder %s45_s13, 2 }
  0x4a   : > { %p115_p7 = scmp.ne.s32.totalorder %s2401_s20, %s2397_s19  ;;  %p116_p6 = scmp.eq.s32.totalorder %s2413_s23, 0 }
  0x4b   : > { %p2094_p9 = scmp.lt.s32.totalorder %s2413_s23, 2  ;;  %s2958_s13 = smov (%p47_p12, %s45_s13), 0 }
  0x4c   : > { %p117_p13 = por %p116_p6, %p115_p7  ;;  %p2633_p0 = por %p2548_p2, %p115_p7 }
  0x4d   : > { %s103_s12 = ssub.s32 %s2409_s22, %s2958_s13  ;;  %s518_s29 = sand.u32 1, %s2401_s20  }
  0x4e   : > { %2081 = dma.hbm_to_vmem [thread:$0]  (!%p2573_p11), %s2940_s9, 256, %s473_s17, [#allocation9], %s2418_s16, %s2418_s16, %s2419_s25  }
  0x4f   : > { %p106_p3 = scmp.eq.s32.totalorder %s103_s12, 0  ;;  %s1840_s16 = sshll.u32 %s518_s29, 5 }
  0x50   : > { %s1891_s25 = sshll.u32 %s2409_s22, 9  ;;  %s522_s4 = scalar_lea.vmem [#allocation2], %s1840_s16 }
  0x51   : > { %s2642_s17 = scalar_select %p106_p3, %s2401_s20, %s108_s24  }
  0x52   : > { %s529_s14 = scalar_lea.hbm %s2903_s2, %s1891_s25  ;;  %s530_s5 = sshll.u32 %s522_s4, 4  ;;  %s531_s5 = int_to_ptr.vmem [resolvable:$true] %s530_s5 }
  0x53   : > { %p2649_p11 = pnand %p2094_p9, %p117_p13  ;;  %s519_s6 = scalar_lea.sflag [#allocation3], %s518_s29 }
  0x54   : > { %s2310_s12 = scalar_lea.vmem %s531_s5, 512  ;;  %s2421_s24 = smov [#allocation2]  }
  0x55   : > { %p2299_p2 = pneg %p2649_p11  ;;  %p2311_p5 = scmp.ne.s32.totalorder %s531_s5, %s2310_s12 }
  0x56   : > { %s2315_s9 = sshll.u32 %s2421_s24, 4  ;;  %s2316_s9 = int_to_ptr.vmem [resolvable:$false] %s2315_s9 }
  0x57   : > { %p2313_p10 = pnand %p2311_p5, %p2299_p2  ;;  %s2317_s25 = scalar_lea.vmem %s2316_s9, 1024 }
  0x58   : > { %p2318_p7 = scmp.lt.s32.totalorder %s531_s5, %s2316_s9  ;;  %p2319_p6 = scmp.lt.s32.totalorder %s2317_s25, %s2310_s12 }
  0x59   : > { %p2314_p12 = pneg %p2313_p10 }
  0x5a   : > { %p2320_p3 = por %p2319_p6, %p2318_p7 }
  0x5c   : > { %p2321_p9 = pnand %p2320_p3, %p2314_p12 }
  0x5e   : > { %2324 = shalt.err (!%p2321_p9)
}
  0x5f   : > { %s2422_s4 = smov 128   ;;  %s2423_s16 = smov 8  }
  0x60   : > { %2085 = dma.hbm_to_vmem [thread:$0]  (!%p2649_p11), %s529_s14, 512, %s531_s5, %s519_s6, %s2422_s4, %s2422_s4, %s2423_s16  }
  0x61   : > { %542 = sbr.rel (%p2564_p8) target bundleno = 3600 (0xe10), region = 80  ;;  %s2660_s29 = sand.u32 (!%p2564_p8), 1, %s2397_s19  }
  0x62   : > { %s1844_s18 = sshll.u32 (!%p2564_p8), %s2660_s29, 5  ;;  %s545_s9 = scalar_lea.sflag (!%p2564_p8), [#allocation3], %s2660_s29 }
  0x63   : > { %s2664_s15 = scalar_lea.vmem (!%p2564_p8), [#allocation2], %s1844_s18 }
  0x66   : > { %2376 = dma.done.wait (%p2554_p4), %s545_s9, 512  }
  0x67   : > { %2378 = vsyncadd (%p2554_p4), %s545_s9, 4294966784 }
  0x68   : > { %2380 = dma.done.wait (%p2544_p1), [#allocation6], 512  }
  0x69   : > { %2382 = vsyncadd (%p2544_p1), [#allocation6], 4294966784 }
  0x6a   : > { %2384 = dma.done.wait (%p2544_p1), [#allocation9], 512  }
  0x6b   : > { %2386 = vsyncadd (%p2544_p1), [#allocation9], 4294966784  ;;  %p622_p8 = scmp.lt.s32.totalorder %s2405_s21, 1  ;;  %v2424_v0 = vmov 0.0   ;;  %vm2425_vm0 = vmmov 0   ;;  %v2161_v1 = vld [vmem:[%s2904_s3 + $0x8] sm:$0xff]  }
  0x6c   : > { %1933 = vmatprep.subr.bf16.mxu1 %v2424_v0  ;;  %1937 = vmatprep.mubr.msk.bf16.mxu1 %vm2425_vm0, %v2424_v0  ;;  %v2162_v2 = vld [vmem:[%s2904_s3] sm:$0xff]   ;;  %vm657_vm1 = vcmask 261120   ;;  %v2163_v4 = vld [vmem:[#allocation5 + $0x8] sm:$0xff]   ;;  %vm821_vm2 = vcmask 64512   ;;  %s2426_s18 = smov 120   ;;  %v2165_v21 = vld [vmem:[#allocation7 + $0x8] sm:$0xff]  }
  0x6d   : > { %s623_s5 = scalar_select %p622_p8, %s2405_s21, 1  ;;  %1949 = vmatprep.subr.bf16.mxu0 %v2424_v0  ;;  %1953 = vmatprep.mubr.msk.bf16.mxu0 %vm2425_vm0, %v2424_v0  ;;  %v2164_v6 = vld [vmem:[#allocation5] sm:$0xff]   ;;  %v2166_v22 = vld [vmem:[#allocation7] sm:$0xff]   ;;  %v637_v33 = vld [vmem:[%s2664_s15 + $0x8] sm:$0xff]  ;;  %vm883_vm3 = vcmask 1043456   ;;  %vm1596_vm4 = vcmask 523264  }
  0x6e   : > { %1934 = vmatpush3.bf16.msra.mxu1 %v2161_v1  ;;  %1950 = vmatpush3.bf16.msra.mxu0 %v2165_v21  ;;  %v636_v26 = vld [vmem:[%s2664_s15] sm:$0xff]  ;;  %s2427_s9 = smov 112   ;;  %s2944_s28 = sld [smem:[#allocation23_spill]] }
  0x6f   : > { %s1850_s6 = sshll.u32 %s623_s5, 3  ;;  %1935 = vmatprep.subr.bf16.mxu1 %v2424_v0  ;;  %1951 = vmatprep.subr.bf16.mxu0 %v2424_v0  ;;  %v1044_v60 = vld [vmem:[#allocation8 + $0x4] sm:$0xf]  ;;  %s2428_s5 = smov 104  }
  0x70   : > { %s628_s30 = scalar_lea.vmem %s2901_s0, %s1850_s6  ;;  %s632_s16 = scalar_lea.vmem %s2902_s1, %s1850_s6  ;;  %v1049_v61 = vsel %vm883_vm3, %v1044_v60, 0 }
  0x71   : > { %v2695_v3 = vld [vmem:[%s628_s30] sm:$0xff]  ;;  %s1849_s26 = sshll.u32 %s2660_s29, 3  ;;  %s2945_s27 = sld [smem:[#allocation24_spill]] }
  0x72   : > { %v640_v5 = vpack.c.bf16 %v2695_v3, %v2695_v3  ;;  %1936 = vmatpush3.bf16.msra.mxu1 %v2162_v2  ;;  %v635_v7 = vld [vmem:[%s632_s16] sm:$0xff]  ;;  %1952 = vmatpush3.bf16.msra.mxu0 %v2166_v22  ;;  %s2946_s25 = sld [smem:[#allocation25_spill]]  ;;  %s1888_s4 = sshll.u32 %s2405_s21, 7 }
  0x73   : > { %1941 = vmatprep.subr.bf16.mxu1 %v2424_v0  ;;  %v702_v8 = vpack.c.bf16 %v635_v7, %v635_v7  ;;  %1963 = vmatprep.subr.bf16.mxu0 %v2424_v0  ;;  %s621_s16 = scalar_lea.vmem [#allocation11], %s1849_s26  ;;  %s2429_s14 = smov [#allocation11]  }
  0x75   : > { %1938 = vmatmul.mubr.msk.bf16.vlgmr.msra.gmra.mxu1 %vm657_vm1, %v640_v5  ;;  %1954 = vmatmul.mubr.msk.bf16.vlgmr.msra.gmra.mxu0 %vm657_vm1, %v702_v8 }
  0x76   : > { %1942 = vmatpush3.bf16.msra.mxu1 %v2163_v4  ;;  %1945 = vmatprep.mubr.msk.bf16.mxu1 %vm2425_vm0, %v2424_v0  ;;  %v928_v4 = vld [vmem:[#allocation8] sm:$0xf] }
  0x77   : > { %1943 = vmatprep.subr.bf16.mxu1 %v2424_v0  ;;  %1965 = vmatprep.mubr.msk.bf16.mxu0 %vm2425_vm0, %v2424_v0  ;;  %v1095_v7 = vsel %vm883_vm3, %v928_v4, 0 }
  0x7a   : > { %1944 = vmatpush3.bf16.msra.mxu1 %v2164_v6 }
  0x7b   : > { %1957 = vmatprep.subr.bf16.mxu1 %v2424_v0 }
  0x7d   : > { %1946 = vmatmul.mubr.msk.bf16.vlgmr.msra.gmra.mxu1 %vm657_vm1, %v702_v8 }
  0x7e   : > { %1959 = vmatprep.mubr.msk.bf16.mxu1 %vm2425_vm0, %v2424_v0 }
 0x135   : > { %v695_v9 = vpop.f32.mrf.mxu1  ;;  %v812_v43 = vpop.f32.mrf.mxu0 }
 0x136   : > { %v701_v14 = vmul.f32 0.17677669, %v695_v9  ;;  %v2742_v49 = vpack.c.bf16 %v812_v43, %v812_v43 }
 0x137   : > { %v1939_v10 = vpop.f32.mrf.mxu1  ;;  %v1955_v44 = vpop.f32.mrf.mxu0 }
 0x138   : > { %v2718_v19 = vpack.c.bf16 %v701_v14, %v701_v14  ;;  %v885_v50 = vsel %vm883_vm3, %v2742_v49, 0 }
 0x139   : > { %v698_v11 = vpop.f32.mrf.mxu1  ;;  %v815_v45 = vpop.f32.mrf.mxu0  ;;  %1964 = vmatpush3.bf16.msra.mxu0 %v885_v50 }
 0x13a   : > { %1975 = vmatprep.subr.bf16.mxu0 %v2424_v0 }
 0x13b   : > { %v1940_v12 = vpop.f32.mrf.mxu1  ;;  %v1956_v46 = vpop.f32.mrf.mxu0 }
 0x13d   : > { %v756_v13 = vpop.f32.mrf.mxu1 }
 0x13e   : > { %v2712_v15 = vpack.c.bf16 %v756_v13, %v756_v13 }
 0x13f   : > { %v1947_v16 = vpop.f32.mrf.mxu1 }
 0x140   : > { %933 = vrot.lane.b32.xlu0 %v2712_v15, %s2426_s18  ;;  %v826_v17 = vsel %vm821_vm2, %v2712_v15, 0 }
 0x141   : > { %v759_v18 = vpop.f32.mrf.mxu1  ;;  %1958 = vmatpush3.bf16.xpose.msra.mxu1 %v826_v17 }
 0x142   : > { %1969 = vmatprep.subr.bf16.mxu1 %v2424_v0 }
 0x143   : > { %v1948_v20 = vpop.f32.mrf.mxu1 }
 0x144   : > { %930 = vrot.lane.b32.xlu0 %v2718_v19, %s2426_s18 }
 0x148   : > { %1960 = vmatmul.mubr.msk.bf16.vlgmr.msra.gmra.mxu1 %vm821_vm2, %v2718_v19 }
 0x149   : > { %1971 = vmatprep.mubr.msk.bf16.mxu1 %vm2425_vm0, %v2424_v0 }
 0x1b2   : > { %v934_v23 = vpop.permute.xlu0 %933 }
 0x1b3   : > { %v939_v24 = vsel %vm821_vm2, %v934_v23, 0 }
 0x1b4   : > { %1970 = vmatpush3.bf16.xpose.msra.mxu1 %v939_v24 }
 0x1b5   : > { %1981 = vmatprep.subr.bf16.mxu1 %v2424_v0 }
 0x1b6   : > { %v931_v25 = vpop.permute.xlu0 %930 }
 0x1bb   : > { %1972 = vmatmul.mubr.msk.bf16.vlgmr.msra.gmra.mxu1 %vm821_vm2, %v931_v25 }
 0x1bc   : > { %1983 = vmatprep.mubr.msk.bf16.mxu1 %vm2425_vm0, %v2424_v0  ;;  %1982 = vmatpush3.bf16.msra.mxu1 %v1049_v61 }
 0x1bd   : > { %1993 = vmatprep.subr.bf16.mxu1 %v2424_v0 }
 0x208   : > { %v862_v27 = vpop.f32.mrf.mxu1 }
 0x209   : > { %v863_v28 = vadd.f32 %v862_v27, %v636_v26 }
 0x20a   : > { %v1961_v29 = vpop.f32.mrf.mxu1 }
 0x20b   : > { %v868_v30 = vsel %vm821_vm2, %v863_v28, -inf }
 0x20c   : > { %869 = vmax.xlane.f32.xlu1 %v868_v30  ;;  %v865_v31 = vpop.f32.mrf.mxu1 }
 0x20e   : > { %v1962_v32 = vpop.f32.mrf.mxu1 }
 0x27b   : > { %v975_v34 = vpop.f32.mrf.mxu1 }
 0x27c   : > { %v976_v35 = vadd.f32 %v975_v34, %v637_v33  ;;  %v638_v33 = vld [vmem:[%s2664_s15 + $0x10] sm:$0xff] }
 0x27d   : > { %v1973_v36 = vpop.f32.mrf.mxu1 }
 0x27e   : > { %v981_v37 = vsel %vm821_vm2, %v976_v35, -inf }
 0x27f   : > { %982 = vmax.xlane.f32.xlu1 %v981_v37  ;;  %v978_v38 = vpop.f32.mrf.mxu1 }
 0x281   : > { %v1974_v39 = vpop.f32.mrf.mxu1 }
 0x295   : > { %v870_v40 = vpop.xlane.xlu1 %869 }
 0x296   : > { %v871_v41 = vsub.f32 %v863_v28, %v870_v40 }
 0x298   : > { %v872_v42 = vmul.f32 1.442695, %v871_v41 }
 0x29a   : > { %2173 = vpow2.f32 %v872_v42 }
 0x2a7   : > { %v2174_v47 = vpop.eup %2173 }
 0x2a8   : > { %v874_v48 = vsel %vm821_vm2, %v2174_v47, 0.0 }
 0x2a9   : > { %875 = vadd.xlane.f32.xlu0 %v874_v48 }
 0x2bf   : > { %1199 = vrot.lane.b32.xlu0 %v2742_v49, %s2427_s9 }
 0x308   : > { %v983_v51 = vpop.xlane.xlu1 %982 }
 0x309   : > { %v984_v52 = vsub.f32 %v976_v35, %v983_v51 }
 0x30b   : > { %v985_v53 = vmul.f32 1.442695, %v984_v52 }
 0x30d   : > { %2175 = vpow2.f32 %v985_v53 }
 0x31a   : > { %v2176_v54 = vpop.eup %2175 }
 0x31b   : > { %v987_v55 = vsel %vm821_vm2, %v2176_v54, 0.0 }
 0x31c   : > { %988 = vadd.xlane.f32.xlu1 %v987_v55 }
 0x32d   : > { %994 = vrot.lane.b32.xlu1 %v2742_v49, %s2426_s18  ;;  %s1686_s18 = sshll.u32 %s621_s16, 4  ;;  %s1687_s18 = int_to_ptr.vmem [resolvable:$true] %s1686_s18 }
 0x32e   : > { %s2325_s30 = scalar_lea.vmem %s1687_s18, 128 }
 0x32f   : > { %p2326_p1 = scmp.ne.s32.totalorder %s1687_s18, %s2325_s30 }
 0x331   : > { %1139 = vrot.lane.b32.xlu1 %v2712_v15, %s2427_s9  ;;  %p2327_p4 = pnand %p2326_p1, %p2633_p0 }
 0x332   : > { %v876_v56 = vpop.xlane.xlu0 %875 }
 0x333   : > { %2177 = vrcp.f32 %v876_v56  ;;  %p2328_p13 = pneg %p2327_p4 }
 0x335   : > { %1137 = vrot.lane.b32.xlu1 %v2718_v19, %s2427_s9 }
 0x336   : > { %v1200_v8 = vpop.permute.xlu0 %1199 }
 0x337   : > { %v1205_v12 = vsel %vm883_vm3, %v1200_v8, 0 }
 0x340   : > { %v2178_v57 = vpop.eup %2177 }
 0x341   : > { %v878_v58 = vmul.f32 %v2178_v57, %v2174_v47 }
 0x343   : > { %v879_v59 = vpack.c.bf16 %v878_v58, %v878_v58  ;;  %v639_v58 = vld [vmem:[%s2664_s15 + $0x18] sm:$0xff]  ;;  %s2947_s15 = sld [smem:[#allocation26_spill]] }
 0x345   : > { %1966 = vmatmul.mubr.msk.bf16.vlgmr.msra.gmra.mxu0 %vm821_vm2, %v879_v59 }
 0x346   : > { %1977 = vmatprep.mubr.msk.bf16.mxu0 %vm2425_vm0, %v2424_v0 }
 0x349   : > { %s1684_s6 = scalar_lea.hbm %s2947_s15, %s1888_s4 }
 0x3a5   : > { %v989_v62 = vpop.xlane.xlu1 %988 }
 0x3a6   : > { %2179 = vrcp.f32 %v989_v62 }
 0x3a9   : > { %v995_v63 = vpop.permute.xlu1 %994 }
 0x3aa   : > { %v1000_v1 = vsel %vm883_vm3, %v995_v63, 0 }
 0x3ab   : > { %1976 = vmatpush3.bf16.msra.mxu0 %v1000_v1 }
 0x3ac   : > { %1987 = vmatprep.subr.bf16.mxu0 %v2424_v0 }
 0x3ad   : > { %v1140_v16 = vpop.permute.xlu1 %1139 }
 0x3ae   : > { %v1145_v21 = vsel %vm821_vm2, %v1140_v16, 0 }
 0x3b1   : > { %v1138_v24 = vpop.permute.xlu1 %1137 }
 0x3b3   : > { %v2180_v2 = vpop.eup %2179 }
 0x3b4   : > { %v991_v5 = vmul.f32 %v2180_v2, %v2176_v54 }
 0x3b6   : > { %v992_v6 = vpack.c.bf16 %v991_v5, %v991_v5 }
 0x3b8   : > { %1978 = vmatmul.mubr.msk.bf16.vlgmr.msra.gmra.mxu0 %vm821_vm2, %v992_v6 }
 0x3b9   : > { %1988 = vmatpush3.bf16.msra.mxu0 %v1095_v7  ;;  %1989 = vmatprep.mubr.msk.bf16.mxu0 %vm2425_vm0, %v2424_v0 }
 0x3ba   : > { %1999 = vmatprep.subr.bf16.mxu0 %v2424_v0 }
 0x405   : > { %v921_v9 = vpop.f32.mrf.mxu0 }
 0x406   : > { %v927_v10 = vpack.c.bf16 %v921_v9, %v921_v9 }
 0x407   : > { %v1967_v11 = vpop.f32.mrf.mxu0 }
 0x408   : > { %1990 = vmatmul.mubr.msk.bf16.vlgmr.msra.gmra.mxu0 %vm821_vm2, %v927_v10 }
 0x409   : > { %2000 = vmatpush3.bf16.msra.mxu0 %v1205_v12  ;;  %v924_v13 = vpop.f32.mrf.mxu0  ;;  %2001 = vmatprep.mubr.msk.bf16.mxu0 %vm2425_vm0, %v2424_v0  ;;  %v1409_v12 = vld [vmem:[#allocation8 + $0xc] sm:$0xf] }
 0x40a   : > { %2011 = vmatprep.subr.bf16.mxu0 %v2424_v0  ;;  %v1414_v13 = vsel %vm883_vm3, %v1409_v12, 0 }
 0x40b   : > { %v1968_v14 = vpop.f32.mrf.mxu0 }
 0x478   : > { %v1036_v17 = vpop.f32.mrf.mxu0 }
 0x479   : > { %v1042_v18 = vpack.c.bf16 %v1036_v17, %v1036_v17 }
 0x47a   : > { %v1979_v20 = vpop.f32.mrf.mxu0 }
 0x47b   : > { %1984 = vmatmul.mubr.msk.bf16.vlgmr.msra.gmra.mxu1 %vm821_vm2, %v1042_v18 }
 0x47c   : > { %1994 = vmatpush3.bf16.xpose.msra.mxu1 %v1145_v21  ;;  %v1039_v22 = vpop.f32.mrf.mxu0  ;;  %1995 = vmatprep.mubr.msk.bf16.mxu1 %vm2425_vm0, %v2424_v0 }
 0x47d   : > { %2005 = vmatprep.subr.bf16.mxu1 %v2424_v0 }
 0x47e   : > { %v1980_v23 = vpop.f32.mrf.mxu0 }
 0x483   : > { %1996 = vmatmul.mubr.msk.bf16.vlgmr.msra.gmra.mxu1 %vm821_vm2, %v1138_v24 }
 0x484   : > { %2007 = vmatprep.mubr.msk.bf16.mxu1 %vm2425_vm0, %v2424_v0 }
 0x4c8   : > { %v2778_v25 = vpop.f32.mrf.mxu0 }
 0x4ca   : > { %v1991_v26 = vpop.f32.mrf.mxu0 }
 0x4cc   : > { %v1134_v27 = vpop.f32.mrf.mxu0 }
 0x4ce   : > { %v1992_v28 = vpop.f32.mrf.mxu0 }
 0x53b   : > { %v2780_v29 = vpop.f32.mrf.mxu1 }
 0x53c   : > { %v1132_v8 = vadd.f32 %v2778_v25, %v2780_v29 }
 0x53d   : > { %v1985_v30 = vpop.f32.mrf.mxu1 }
 0x53f   : > { %v1088_v31 = vpop.f32.mrf.mxu1 }
 0x541   : > { %v1986_v32 = vpop.f32.mrf.mxu1 }
 0x543   : > { %v1181_v34 = vpop.f32.mrf.mxu1 }
 0x544   : > { %v1182_v35 = vadd.f32 %v1181_v34, %v638_v33 }
 0x545   : > { %v1997_v36 = vpop.f32.mrf.mxu1 }
 0x546   : > { %v1187_v37 = vsel %vm821_vm2, %v1182_v35, -inf }
 0x547   : > { %1188 = vmax.xlane.f32.xlu1 %v1187_v37  ;;  %v1184_v38 = vpop.f32.mrf.mxu1 }
 0x549   : > { %v1998_v39 = vpop.f32.mrf.mxu1 }
 0x5d0   : > { %v1189_v40 = vpop.xlane.xlu1 %1188 }
 0x5d1   : > { %v1190_v41 = vsub.f32 %v1182_v35, %v1189_v40  ;;  %v2167_v40 = vld [vmem:[#allocation10 + $0x8] sm:$0xff]  }
 0x5d3   : > { %v1191_v42 = vmul.f32 1.442695, %v1190_v41  ;;  %v2168_v41 = vld [vmem:[#allocation10] sm:$0xff]  }
 0x5d5   : > { %2181 = vpow2.f32 %v1191_v42  ;;  %v2170_v42 = vld [vmem:[%s2912_s11 + $0x10] sm:$0xff]  }
 0x5e2   : > { %v2182_v43 = vpop.eup %2181 }
 0x5e3   : > { %v1193_v44 = vsel %vm821_vm2, %v2182_v43, 0.0 }
 0x5e4   : > { %1194 = vadd.xlane.f32.xlu0 %v1193_v44 }
 0x5fa   : > { %1299 = vrot.lane.b32.xlu0 %v2712_v15, %s2428_s5 }
 0x5fe   : > { %1297 = vrot.lane.b32.xlu0 %v2718_v19, %s2428_s5  ;;  %v1249_v19 = vld [vmem:[#allocation8 + $0x8] sm:$0xf] }
 0x5ff   : > { %v1254_v52 = vsel %vm883_vm3, %v1249_v19, 0 }
 0x600   : > { %2006 = vmatpush3.bf16.msra.mxu1 %v1254_v52  ;;  %v2171_v52 = vld [vmem:[%s2912_s11 + $0x8] sm:$0xff]  }
 0x601   : > { %2017 = vmatprep.subr.bf16.mxu1 %v2424_v0 }
 0x66d   : > { %v1195_v45 = vpop.xlane.xlu0 %1194 }
 0x66e   : > { %2183 = vrcp.f32 %v1195_v45 }
 0x671   : > { %v1300_v48 = vpop.permute.xlu0 %1299 }
 0x672   : > { %v1305_v51 = vsel %vm821_vm2, %v1300_v48, 0 }
 0x675   : > { %v1298_v15 = vpop.permute.xlu0 %1297 }
 0x67b   : > { %v2184_v46 = vpop.eup %2183 }
 0x67c   : > { %v1197_v47 = vmul.f32 %v2184_v46, %v2182_v43 }
 0x67e   : > { %v1198_v50 = vpack.c.bf16 %v1197_v47, %v1197_v47  ;;  %v1873_v47 = vld [vmem:[%s2908_s7] ss:$0 sm:$0xff] }
 0x680   : > { %2002 = vmatmul.mubr.msk.bf16.vlgmr.msra.gmra.mxu0 %vm821_vm2, %v1198_v50  ;;  %v1874_v50 = vld [vmem:[%s2909_s8] ss:$0 sm:$0xff] }
 0x681   : > { %2012 = vmatpush3.bf16.xpose.msra.mxu0 %v1305_v51  ;;  %2013 = vmatprep.mubr.msk.bf16.mxu0 %vm2425_vm0, %v2424_v0 }
 0x682   : > { %2023 = vmatprep.subr.bf16.mxu0 %v2424_v0 }
 0x688   : > { %2014 = vmatmul.mubr.msk.bf16.vlgmr.msra.gmra.mxu0 %vm821_vm2, %v1298_v15 }
 0x689   : > { %2025 = vmatprep.mubr.msk.bf16.mxu0 %vm2425_vm0, %v2424_v0  ;;  %2024 = vmatpush3.bf16.msra.mxu0 %v1414_v13 }
 0x68a   : > { %2037 = vmatprep.subr.bf16.mxu0 %v2424_v0 }
 0x740   : > { %v1241_v53 = vpop.f32.mrf.mxu0 }
 0x741   : > { %v1247_v54 = vpack.c.bf16 %v1241_v53, %v1241_v53  ;;  %v2172_v53 = vld [vmem:[%s2912_s11] sm:$0xff]  }
 0x742   : > { %v2003_v55 = vpop.f32.mrf.mxu0 }
 0x743   : > { %2008 = vmatmul.mubr.msk.bf16.vlgmr.msra.gmra.mxu1 %vm821_vm2, %v1247_v54 }
 0x744   : > { %v1244_v56 = vpop.f32.mrf.mxu0  ;;  %2019 = vmatprep.mubr.msk.bf16.mxu1 %vm2425_vm0, %v2424_v0 }
 0x746   : > { %v2004_v57 = vpop.f32.mrf.mxu0 }
 0x748   : > { %v1341_v59 = vpop.f32.mrf.mxu0 }
 0x749   : > { %v1342_v60 = vadd.f32 %v1341_v59, %v639_v58 }
 0x74a   : > { %v2015_v61 = vpop.f32.mrf.mxu0 }
 0x74b   : > { %v1347_v62 = vsel %vm821_vm2, %v1342_v60, -inf }
 0x74c   : > { %1348 = vmax.xlane.f32.xlu0 %v1347_v62  ;;  %v1344_v63 = vpop.f32.mrf.mxu0 }
 0x74e   : > { %v2016_v1 = vpop.f32.mrf.mxu0 }
 0x7d5   : > { %v1349_v2 = vpop.xlane.xlu0 %1348 }
 0x7d6   : > { %v1350_v4 = vsub.f32 %v1342_v60, %v1349_v2 }
 0x7d8   : > { %v1351_v5 = vmul.f32 1.442695, %v1350_v4 }
 0x7da   : > { %2185 = vpow2.f32 %v1351_v5 }
 0x7e7   : > { %v2186_v6 = vpop.eup %2185 }
 0x7e8   : > { %v1353_v7 = vsel %vm821_vm2, %v2186_v6, 0.0 }
 0x7e9   : > { %1354 = vadd.xlane.f32.xlu1 %v1353_v7 }
 0x7fa   : > { %1359 = vrot.lane.b32.xlu1 %v2742_v49, %s2428_s5  ;;  %s2943_s5 = sld [smem:[#allocation22_spill]] }
 0x800   : > { %v1875_v54 = vld [vmem:[%s2943_s5] ss:$0 sm:$0xff] }
 0x803   : > { %v1290_v9 = vpop.f32.mrf.mxu1 }
 0x804   : > { %v1296_v10 = vadd.f32 %v1290_v9, %v1132_v8 }
 0x805   : > { %v2009_v11 = vpop.f32.mrf.mxu1 }
 0x807   : > { %v1293_v14 = vpop.f32.mrf.mxu1 }
 0x809   : > { %v2010_v16 = vpop.f32.mrf.mxu1 }
 0x872   : > { %v1355_v17 = vpop.xlane.xlu1 %1354 }
 0x873   : > { %2187 = vrcp.f32 %v1355_v17  ;;  %v1885_v17 = vld [vmem:[%s2945_s27] ss:$0 sm:$0xff]  ;;  %s2329_s27 = sshll.u32 %s2429_s14, 4  ;;  %s2330_s27 = int_to_ptr.vmem [resolvable:$false] %s2329_s27 }
 0x874   : > { %s2331_s21 = scalar_lea.vmem %s2330_s27, 256  ;;  %p2332_p11 = scmp.lt.s32.totalorder %s1687_s18, %s2330_s27 }
 0x875   : > { %p2333_p2 = scmp.lt.s32.totalorder %s2331_s21, %s2325_s30 }
 0x876   : > { %v1360_v18 = vpop.permute.xlu1 %1359 }
 0x877   : > { %v1365_v20 = vsel %vm883_vm3, %v1360_v18, 0  ;;  %p2334_p5 = por %p2333_p2, %p2332_p11 }
 0x878   : > { %2018 = vmatpush3.bf16.msra.mxu1 %v1365_v20  ;;  %v1886_v20 = vld [vmem:[%s2946_s25] ss:$0 sm:$0xff] }
 0x879   : > { %2029 = vmatprep.subr.bf16.mxu1 %v2424_v0  ;;  %p2335_p10 = pnand %p2334_p5, %p2328_p13 }
 0x880   : > { %v2188_v49 = vpop.eup %2187 }
 0x881   : > { %v1357_v21 = vmul.f32 %v2188_v49, %v2186_v6 }
 0x883   : > { %v1358_v22 = vpack.c.bf16 %v1357_v21, %v1357_v21 }
 0x885   : > { %2020 = vmatmul.mubr.msk.bf16.vlgmr.msra.gmra.mxu1 %vm821_vm2, %v1358_v22 }
 0x886   : > { %2033 = vmatprep.mubr.msk.bf16.mxu1 %vm2425_vm0, %v2424_v0  ;;  %2030 = vmatpush3.bf16.msra.mxu1 %v2167_v40 }
 0x887   : > { %2031 = vmatprep.subr.bf16.mxu1 %v2424_v0 }
 0x88a   : > { %2032 = vmatpush3.bf16.msra.mxu1 %v2168_v41 }
 0x945   : > { %v1401_v23 = vpop.f32.mrf.mxu1 }
 0x946   : > { %v1407_v24 = vpack.c.bf16 %v1401_v23, %v1401_v23 }
 0x947   : > { %v2021_v25 = vpop.f32.mrf.mxu1 }
 0x948   : > { %2026 = vmatmul.mubr.msk.bf16.vlgmr.msra.gmra.mxu0 %vm821_vm2, %v1407_v24 }
 0x949   : > { %v1404_v26 = vpop.f32.mrf.mxu1  ;;  %2045 = vmatprep.mubr.msk.bf16.mxu0 %vm2425_vm0, %v2424_v0 }
 0x94b   : > { %v2022_v27 = vpop.f32.mrf.mxu1 }
 0xa08   : > { %v1450_v28 = vpop.f32.mrf.mxu0 }
 0xa09   : > { %v1456_v29 = vadd.f32 %v1450_v28, %v1296_v10 }
 0xa0a   : > { %v2027_v30 = vpop.f32.mrf.mxu0 }
 0xa0b   : > { %v1457_v31 = vadd.f32 %v1456_v29, %v2695_v3  ;;  %v2169_v3 = vld [vmem:[%s2912_s11 + $0x18] sm:$0xff]  }
 0xa0c   : > { %v1453_v32 = vpop.f32.mrf.mxu0  ;;  %2038 = vmatpush3.bf16.msra.mxu0 %v2169_v3 }
 0xa0d   : > { %v1458_v33 = vsel %vm657_vm1, %v1457_v31, 0.0  ;;  %2039 = vmatprep.subr.bf16.mxu0 %v2424_v0 }
 0xa0e   : > { %1459 = vadd.xlane.f32.xlu1 %v1458_v33  ;;  %v2028_v34 = vpop.f32.mrf.mxu0 }
 0xa10   : > { %2040 = vmatpush3.bf16.msra.mxu0 %v2170_v42 }
 0xa11   : > { %2041 = vmatprep.subr.bf16.mxu0 %v2424_v0 }
 0xa14   : > { %2042 = vmatpush3.bf16.msra.mxu0 %v2171_v52 }
 0xa15   : > { %2043 = vmatprep.subr.bf16.mxu0 %v2424_v0  ;;  %v1879_v0 = vld [vmem:[%s2944_s28] ss:$0 sm:$0xff]  ;;  %s1672_s28 = scalar_lea.sflag [#allocation4], %s2660_s29 }
 0xa18   : > { %2044 = vmatpush3.bf16.msra.mxu0 %v2172_v53 }
 0xa97   : > { %v1460_v35 = vpop.xlane.xlu1 %1459 }
 0xa98   : > { %v1462_v36 = vmul.f32 0.03125, %v1460_v35 }
 0xa9a   : > { %v1463_v37 = vsub.f32 %v1457_v31, %v1462_v36 }
 0xa9c   : > { %v1464_v38 = vmul.f32 %v1463_v37, %v1463_v37 }
 0xa9e   : > { %v1465_v39 = vsel %vm657_vm1, %v1464_v38, 0.0 }
 0xa9f   : > { %1466 = vadd.xlane.f32.xlu0 %v1465_v39 }
 0xb28   : > { %v1467_v43 = vpop.xlane.xlu0 %1466 }
 0xb29   : > { %v1468_v44 = vmul.f32 0.03125, %v1467_v43 }
 0xb2b   : > { %v1469_v45 = vadd.f32 1e-12, %v1468_v44 }
 0xb2d   : > { %2189 = vrsqrt.f32 %v1469_v45 }
 0xb3a   : > { %v2190_v46 = vpop.eup %2189 }
 0xb3b   : > { %v1471_v48 = vmul.f32 %v2190_v46, %v1463_v37 }
 0xb3d   : > { %v1479_v51 = vmul.f32 %v1873_v47, %v1471_v48 }
 0xb3f   : > { %v1487_v15 = vadd.f32 %v1874_v50, %v1479_v51 }
 0xb41   : > { %v1488_v19 = vpack.c.bf16 %v1487_v15, %v1487_v15 }
 0xb43   : > { %2034 = vmatmul.mubr.msk.bf16.vlgmr.msra.gmra.mxu1 %vm657_vm1, %v1488_v19 }
 0xc03   : > { %v1549_v55 = vpop.f32.mrf.mxu1 }
 0xc04   : > { %v1550_v56 = vadd.f32 %v1875_v54, %v1549_v55 }
 0xc05   : > { %v2035_v57 = vpop.f32.mrf.mxu1 }
 0xc06   : > { %v1555_v58 = vmax.f32 %v1550_v56, 0.0 }
 0xc07   : > { %v1552_v59 = vpop.f32.mrf.mxu1 }
 0xc08   : > { %v1556_v60 = vpack.c.bf16 %v1555_v58, %v1555_v58 }
 0xc09   : > { %v2036_v61 = vpop.f32.mrf.mxu1 }
 0xc0a   : > { %2046 = vmatmul.mubr.msk.bf16.vlgmr.msra.gmra.mxu0 %vm1596_vm4, %v1556_v60 }
 0xcca   : > { %v1634_v62 = vpop.f32.mrf.mxu0 }
 0xccb   : > { %v1635_v63 = vadd.f32 %v1879_v0, %v1634_v62 }
 0xccc   : > { %v2047_v1 = vpop.f32.mrf.mxu0 }
 0xccd   : > { %v1640_v2 = vadd.f32 %v1635_v63, %v1487_v15 }
 0xcce   : > { %v1637_v4 = vpop.f32.mrf.mxu0 }
 0xccf   : > { %v1641_v5 = vsel %vm657_vm1, %v1640_v2, 0.0 }
 0xcd0   : > { %1642 = vadd.xlane.f32.xlu0 %v1641_v5  ;;  %v2048_v6 = vpop.f32.mrf.mxu0 }
 0xd59   : > { %v1643_v7 = vpop.xlane.xlu0 %1642 }
 0xd5a   : > { %v1644_v8 = vmul.f32 0.03125, %v1643_v7 }
 0xd5c   : > { %v1645_v9 = vsub.f32 %v1640_v2, %v1644_v8 }
 0xd5e   : > { %v1646_v10 = vmul.f32 %v1645_v9, %v1645_v9 }
 0xd60   : > { %v1647_v11 = vsel %vm657_vm1, %v1646_v10, 0.0 }
 0xd61   : > { %1648 = vadd.xlane.f32.xlu0 %v1647_v11 }
 0xdea   : > { %v1649_v12 = vpop.xlane.xlu0 %1648 }
 0xdeb   : > { %v1650_v13 = vmul.f32 0.03125, %v1649_v12 }
 0xded   : > { %v1651_v14 = vadd.f32 1e-12, %v1650_v13 }
 0xdef   : > { %2191 = vrsqrt.f32 %v1651_v14 }
 0xdfc   : > { %v2192_v16 = vpop.eup %2191 }
 0xdfd   : > { %v1653_v18 = vmul.f32 %v2192_v16, %v1645_v9 }
 0xdff   : > { %v1661_v49 = vmul.f32 %v1885_v17, %v1653_v18 }
 0xe01   : > { %v1669_v21 = vadd.f32 %v1886_v20, %v1661_v49 }
 0xe03   : > { %1670 = vst.msk [vmem:[%s621_s16] sm:$0xff] %vm657_vm1, %v1669_v21 }
 0xe04   : > { %2338 = shalt.err (!%p2335_p10)
}
 0xe05   : > { %s2339_s26 = scalar_lea.hbm %s1684_s6, 128  ;;  %s2343_s24 = scalar_lea.hbm %s2947_s15, 256 }
 0xe06   : > { %p2340_p12 = scmp.ne.s32.totalorder %s1684_s6, %s2339_s26  ;;  %p2344_p3 = scmp.lt.s32.totalorder %s1684_s6, %s2947_s15 }
 0xe07   : > { %p2345_p9 = scmp.lt.s32.totalorder %s2343_s24, %s2339_s26 }
 0xe08   : > { %p2341_p7 = pnand %p2340_p12, %p2633_p0 }
 0xe09   : > { %p2346_p8 = por %p2345_p9, %p2344_p3 }
 0xe0a   : > { %p2342_p6 = pneg %p2341_p7 }
 0xe0c   : > { %p2347_p1 = pnand %p2346_p8, %p2342_p6 }
 0xe0e   : > { %2350 = shalt.err (!%p2347_p1)
}
 0xe0f   : > { %2067 = dma.vmem_to_hbm [thread:$0]  (%p2633_p0), %s1687_s18, 128, %s1684_s6, %s1672_s28  }
 0xe10 PF: > { %s2948_s16 = sld [smem:[#allocation16_spill]]  ;;  %p2951_p13 = scmp.ge.s32.totalorder %s2413_s23, 2 }
 0xe11   : > { %s2949_s9 = sld [smem:[#allocation17_spill]] }
 0xe16   : > { %s1698_s5 = sand.u32 1, %s2948_s16  }
 0xe17   : > { %p2950_p4 = scmp.ne.s32.totalorder %s2949_s9, 0  ;;  %s1699_s30 = scalar_lea.sflag [#allocation4], %s1698_s5 }
 0xe19   : > { %p2087_p11 = pnand %p2951_p13, %p2950_p4 }
 0xe1b   : > { %p2088_p2 = pneg %p2087_p11 }
 0xe1d   : > { %2388 = dma.done.wait (%p2088_p2), %s1699_s30, 128  }
 0xe1e   : > { %2390 = vsyncadd (%p2088_p2), %s1699_s30, 4294967168  ;;  %s33_s23 = sadd.s32 1, %s2413_s23   ;;  %s2952_s18 = smov %s2397_s19 }
 0xe1f   : > { %p30_p5 = scmp.ge.s32.totalorder %s33_s23, 4   ;;  %s2953_s19 = smov %s2401_s20 }
 0xe20   : > { %s2954_s20 = smov %s2642_s17  ;;  %s2955_s21 = smov %s2409_s22 }
 0xe21   : > { %s2956_s22 = smov %s2958_s13  ;;  %32 = sbr.rel (!%p30_p5) target bundleno = 18 (0x12), region = 150 }
 0xe26   :  { %1704 = vsyncpa [#allocation3], 1 }
 0xe27   :  { %1706 = vsyncpa [#allocation3 + $0x1], 1 }
 0xe28   :  { %1707 = vsyncpa [#allocation6], 1 }
 0xe29   :  { %1708 = vsyncpa [#allocation9], 1 }
 0xe2a   :  { %1709 = vsyncpa [#allocation4], 1 }
 0xe2b   :  { %1711 = vsyncpa [#allocation4 + $0x1], 1 }

</bundles_post_ra>
